<compile_context>
chip_gen: v7x
topology: tpu7x:2x2x1
jax: 0.10.0
libtpu: 0.0.40
codegen_flags: <defaults>
</compile_context>

<pallas_src>
import math
import functools

import jax
import jax.numpy as jnp
from jax.experimental import pallas as pl
from jax.experimental.pallas import tpu as pltpu

LN_EPS = 1e-5  # PyTorch nn.LayerNorm default


# ----------------------------- helpers (in-kernel) -----------------------------

def _layernorm(x, w, b):
    # mean and E[x^2] are independent reductions (no serial dependency);
    # biased variance == PyTorch LayerNorm. All f32 (v5e-safe).
    mean = jnp.mean(x, axis=-1, keepdims=True)
    meansq = jnp.mean(x * x, axis=-1, keepdims=True)
    var = jnp.maximum(meansq - mean * mean, 0.0)
    return (x - mean) * jax.lax.rsqrt(var + LN_EPS) * w + b


# ----------------------------- fused Pallas kernel -----------------------------

def fused_transformer_kernel(x_ref, pe_ref, mask_ref,
                             wqkv_ref, bqkv_ref, wo_ref, bo_ref,
                             n1w_ref, n1b_ref, w1_ref, b1_ref, w2_ref, b2_ref,
                             n2w_ref, n2b_ref, wh_ref, bh_ref,
                             out_ref, *, nhead, nlayers):
    """One batch element per grid step; full TransformerModel forward.

    x_ref    : [1, S, E] f32     pe_ref : [S, E] f32     mask_ref : [S, S] f32
    wqkv     : [L, E, QKVP] bf16 (q|k|v fused, q pre-scaled, lane-padded)
    bqkv     : [L, 1, QKVP] f32
    wo       : [L, E, E] bf16    bo/n*w/n*b/b2 : [L, 1, E] f32
    w1       : [L, E, NHP] bf16  b1 : [L, 1, NHP] f32 (nhid padded to 128)
    w2       : [L, NHP, E] bf16
    wh/bh    : [E, P] bf16 / [1, P] f32  fused, lane-padded decoder heads
    out_ref  : [1, S, P] f32
    """
    _, S, E = x_ref.shape
    hd = E // nhead
    bf16 = jnp.bfloat16

    # src * sqrt(E) + positional encoding (dropout = identity in eval mode)
    # TODO(synk): PositionalEncoding / encoder-layer dropout omitted (eval mode).
    x = x_ref[0] * math.sqrt(E) + pe_ref[...]              # [S, E] f32

    mask = mask_ref[...]                                    # hoisted once; no
                                                            # per-layer broadcast

    # --- encoder layers (static unroll; weights VMEM-resident) ---
    for l in range(nlayers):
        xb = x.astype(bf16)

        # Fused, 128-lane-dense QKV projection (scale folded into q at pack time).
        qkv = jnp.dot(xb, wqkv_ref[l],
                      preferred_element_type=jnp.float32) + bqkv_ref[l]   # [S, QKVP]

        ctx_heads = []
        for h in range(nhead):                              # static; tiny H
            q = qkv[:, h * hd:(h + 1) * hd].astype(bf16)
            k = qkv[:, E + h * hd:E + (h + 1) * hd].astype(bf16)
            v = qkv[:, 2 * E + h * hd:2 * E + (h + 1) * hd].astype(bf16)
            s = jnp.einsum('sd,td->st', q, k,
                           preferred_element_type=jnp.float32) + mask     # [S, S]
            m = jnp.max(s, axis=-1, keepdims=True)
            p = jnp.exp(s - m)
            p = p * pl.reciprocal(jnp.sum(p, axis=-1, keepdims=True), approx=True)
            ctx_heads.append(jnp.dot(p.astype(bf16), v,
                                     preferred_element_type=jnp.float32))  # [S, hd]

        # heads contiguous on the lane axis -> single K=E out-projection matmul
        ctx = jnp.concatenate(ctx_heads, axis=-1)                          # [S, E]
        attn = jnp.dot(ctx.astype(bf16), wo_ref[l],
                       preferred_element_type=jnp.float32) + bo_ref[l]

        # residual + post-norm (nn.TransformerEncoderLayer default)
        x = _layernorm(x + attn, n1w_ref[l], n1b_ref[l])

        # FFN (ReLU); nhid zero-padded to 128 lanes (exact: ReLU(0)=0, padded
        # rows of w2 are zero) -> lane-dense h1, no masked stores.
        h1 = jnp.maximum(
            jnp.dot(x.astype(bf16), w1_ref[l],
                    preferred_element_type=jnp.float32) + b1_ref[l], 0.0)
        ff = jnp.dot(h1.astype(bf16), w2_ref[l],
                     preferred_element_type=jnp.float32) + b2_ref[l]
        x = _layernorm(x + ff, n2w_ref[l], n2b_ref[l])

    # Fused, lane-dense decoder heads [poi | time | cat] (padded to 128 lanes)
    heads = jnp.dot(x.astype(bf16), wh_ref[...],
                    preferred_element_type=jnp.float32) + bh_ref[...]
    out_ref[0] = heads


# ----------------------------- wrapper ------------------------------------------

def transformer_forward(src, src_mask, pp):
    """src: [S, B, E] (seq-first, like PyTorch), src_mask: [S, S] additive mask.

    Returns (out_poi [S,B,num_poi], out_time [S,B,1], out_cat [S,B,num_cat]).
    """
    S, B, E = src.shape
    x = jnp.transpose(src, (1, 0, 2))                      # single boundary transpose
    pe = pp["pe"][:S]                                      # [S, E]
    P = pp["whead"].shape[1]

    def rep(arr):
        # Whole-array VMEM block, same block for every grid step (no re-DMA).
        zeros = (0,) * arr.ndim
        return pl.BlockSpec(arr.shape, lambda b, z=zeros: z)

    kernel = functools.partial(fused_transformer_kernel,
                               nhead=pp["nhead"], nlayers=pp["nlayers"])
    out = pl.pallas_call(
        kernel,
        out_shape=jax.ShapeDtypeStruct((B, S, P), jnp.float32),
        grid=(B,),
        in_specs=[
            pl.BlockSpec((1, S, E), lambda b: (b, 0, 0)),   # x
            rep(pe), rep(src_mask),
            rep(pp["wqkv"]), rep(pp["bqkv"]), rep(pp["wo"]), rep(pp["bo"]),
            rep(pp["n1w"]), rep(pp["n1b"]),
            rep(pp["w1"]), rep(pp["b1"]), rep(pp["w2"]), rep(pp["b2"]),
            rep(pp["n2w"]), rep(pp["n2b"]),
            rep(pp["whead"]), rep(pp["bhead"]),
        ],
        out_specs=pl.BlockSpec((1, S, P), lambda b: (b, 0, 0)),
        compiler_params=pltpu.CompilerParams(
            dimension_semantics=("parallel",)),
    )(x, pe, src_mask,
      pp["wqkv"], pp["bqkv"], pp["wo"], pp["bo"],
      pp["n1w"], pp["n1b"], pp["w1"], pp["b1"], pp["w2"], pp["b2"],
      pp["n2w"], pp["n2b"], pp["whead"], pp["bhead"])

    out = jnp.transpose(out, (1, 0, 2))                    # [S, B, P]
    n_poi, n_time, n_cat = pp["head_splits"]
    return (out[..., :n_poi],
            out[..., n_poi:n_poi + n_time],
            out[..., n_poi + n_time:n_poi + n_time + n_cat])


# ----------------------------- parameter setup ----------------------------------

def make_pe(max_len, d_model):
    position = jnp.arange(max_len, dtype=jnp.float32)[:, None]
    div_term = jnp.exp(jnp.arange(0, d_model, 2, dtype=jnp.float32)
                       * (-math.log(10000.0) / d_model))
    pe = jnp.zeros((max_len, d_model), jnp.float32)
    pe = pe.at[:, 0::2].set(jnp.sin(position * div_term))
    pe = pe.at[:, 1::2].set(jnp.cos(position * div_term))
    return pe


def causal_mask(sz):
    i = jnp.arange(sz)
    return jnp.where(i[None, :] <= i[:, None], 0.0, -jnp.inf).astype(jnp.float32)


def init_params(key, num_poi, num_cat, embed_size, nhead, nhid, nlayers, max_len=500):
    """PyTorch-layout parameters (weights as [out, in], biases 1-D)."""
    E = embed_size

    def u(k, shape, r=0.1):
        return jax.random.uniform(k, shape, jnp.float32, -r, r)

    keys = jax.random.split(key, nlayers + 1)
    layers = []
    for l in range(nlayers):
        k = jax.random.split(keys[l], 6)
        layers.append(dict(
            wqkv=u(k[0], (3 * E, E)), bqkv=jnp.zeros((3 * E,), jnp.float32),
            wo=u(k[1], (E, E)),       bo=jnp.zeros((E,), jnp.float32),
            n1w=jnp.ones((E,), jnp.float32), n1b=jnp.zeros((E,), jnp.float32),
            w1=u(k[2], (nhid, E)),    b1=u(k[3], (nhid,)),
            w2=u(k[4], (E, nhid)),    b2=u(k[5], (E,)),
            n2w=jnp.ones((E,), jnp.float32), n2b=jnp.zeros((E,), jnp.float32),
        ))
    kd = jax.random.split(keys[nlayers], 3)
    return dict(
        layers=layers, pe=make_pe(max_len, E), embed_size=E, nhead=nhead,
        num_poi=num_poi, num_cat=num_cat,
        wpoi=u(kd[0], (num_poi, E)), bpoi=jnp.zeros((num_poi,), jnp.float32),
        wtime=u(kd[1], (1, E)),      btime=jnp.zeros((1,), jnp.float32),
        wcat=u(kd[2], (num_cat, E)), bcat=jnp.zeros((num_cat,), jnp.float32),
    )


def _pad_to(n, m=128):
    return ((n + m - 1) // m) * m


def pack_params(p):
    """Host-side repack: pre-transpose, fuse QKV (+fold 1/sqrt(hd)), pad lanes, bf16."""
    E = p["embed_size"]
    H = p["nhead"]
    hd = E // H
    layers = p["layers"]
    bf = jnp.bfloat16
    scale = 1.0 / math.sqrt(hd)

    QKVP = _pad_to(3 * E)
    nhid = layers[0]["w1"].shape[0]
    NHP = _pad_to(nhid)

    wqkv_l, bqkv_l, wo_l, bo_l = [], [], [], []
    n1w_l, n1b_l, n2w_l, n2b_l = [], [], [], []
    w1_l, b1_l, w2_l, b2_l = [], [], [], []
    for lp in layers:
        wqkv_t = lp["wqkv"].T                                  # [E, 3E], x @ W layout
        bqkv = lp["bqkv"]
        # fold attention scale 1/sqrt(hd) into the q columns / q bias
        wqkv_t = jnp.concatenate([wqkv_t[:, :E] * scale, wqkv_t[:, E:]], axis=1)
        bqkv = jnp.concatenate([bqkv[:E] * scale, bqkv[E:]])
        wqkv_l.append(jnp.pad(wqkv_t, ((0, 0), (0, QKVP - 3 * E))))
        bqkv_l.append(jnp.pad(bqkv, (0, QKVP - 3 * E))[None, :])
        wo_l.append(lp["wo"].T)                                # [E, E]
        bo_l.append(lp["bo"][None, :])
        n1w_l.append(lp["n1w"][None, :]); n1b_l.append(lp["n1b"][None, :])
        w1_l.append(jnp.pad(lp["w1"].T, ((0, 0), (0, NHP - nhid))))
        b1_l.append(jnp.pad(lp["b1"], (0, NHP - nhid))[None, :])
        w2_l.append(jnp.pad(lp["w2"].T, ((0, NHP - nhid), (0, 0))))
        b2_l.append(lp["b2"][None, :])
        n2w_l.append(lp["n2w"][None, :]); n2b_l.append(lp["n2b"][None, :])

    packed = dict(
        wqkv=jnp.stack(wqkv_l).astype(bf), bqkv=jnp.stack(bqkv_l),
        wo=jnp.stack(wo_l).astype(bf),     bo=jnp.stack(bo_l),
        n1w=jnp.stack(n1w_l), n1b=jnp.stack(n1b_l),
        w1=jnp.stack(w1_l).astype(bf), b1=jnp.stack(b1_l),
        w2=jnp.stack(w2_l).astype(bf), b2=jnp.stack(b2_l),
        n2w=jnp.stack(n2w_l), n2b=jnp.stack(n2b_l),
    )

    # fused decoder heads [poi | time | cat], zero-padded to a 128-lane multiple
    wh = jnp.concatenate([p["wpoi"].T, p["wtime"].T, p["wcat"].T], axis=1)   # [E, T]
    bh = jnp.concatenate([p["bpoi"], p["btime"], p["bcat"]])                 # [T]
    T = wh.shape[1]
    P = _pad_to(T)
    packed["whead"] = jnp.pad(wh, ((0, 0), (0, P - T))).astype(bf)
    packed["bhead"] = jnp.pad(bh, (0, P - T))[None, :]
    packed["head_splits"] = (p["num_poi"], 1, p["num_cat"])
    packed["pe"] = p["pe"]
    packed["nhead"] = H
    packed["nlayers"] = len(layers)
    return packed


# ----------------------------- pure-JAX reference --------------------------------

def reference_forward(src, src_mask, p):
    """f32 reference of the PyTorch module (eval mode), for correctness check."""
    E = p["embed_size"]; H = p["nhead"]; hd = E // H
    S, B, _ = src.shape

    def ln(x, w, b):
        mu = jnp.mean(x, axis=-1, keepdims=True)
        var = jnp.mean((x - mu) ** 2, axis=-1, keepdims=True)
        return (x - mu) / jnp.sqrt(var + LN_EPS) * w + b

    x = src * math.sqrt(E) + p["pe"][:S][:, None, :]           # [S, B, E]
    for lp in p["layers"]:
        qkv = x @ lp["wqkv"].T + lp["bqkv"]                    # [S, B, 3E]
        q, k, v = qkv[..., :E], qkv[..., E:2 * E], qkv[..., 2 * E:]

        def split(t):   # [S, B, E] -> [B, H, S, hd]
            return jnp.transpose(t.reshape(S, B, H, hd), (1, 2, 0, 3))

        qh, kh, vh = split(q), split(k), split(v)
        scores = jnp.einsum('bhsd,bhtd->bhst', qh, kh) / math.sqrt(hd)
        scores = scores + src_mask[None, None]
        attn_p = jax.nn.softmax(scores, axis=-1)
        ctx = jnp.einsum('bhst,bhtd->bhsd', attn_p, vh)
        ctx = jnp.transpose(ctx, (2, 0, 1, 3)).reshape(S, B, E)
        attn = ctx @ lp["wo"].T + lp["bo"]
        x = ln(x + attn, lp["n1w"], lp["n1b"])
        h1 = jax.nn.relu(x @ lp["w1"].T + lp["b1"])
        ff = h1 @ lp["w2"].T + lp["b2"]
        x = ln(x + ff, lp["n2w"], lp["n2b"])
    return (x @ p["wpoi"].T + p["bpoi"],
            x @ p["wtime"].T + p["btime"],
            x @ p["wcat"].T + p["bcat"])


# ----------------------------- main ---------------------------------------------

if __name__ == "__main__":
    S, B = 8, 2
    embed_size, nhead, nhid, nlayers = 32, 2, 64, 2
    num_poi, num_cat = 40, 10

    key = jax.random.PRNGKey(0)
    params = init_params(key, num_poi, num_cat, embed_size, nhead, nhid, nlayers)
    packed = pack_params(params)

    src = jax.random.normal(jax.random.fold_in(key, 123), (S, B, embed_size), jnp.float32)
    src_mask = causal_mask(S)   # generate_square_subsequent_mask equivalent

    fwd = jax.jit(lambda s, m: transformer_forward(s, m, packed))
    out_poi, out_time, out_cat = fwd(src, src_mask)
    jax.block_until_ready((out_poi, out_time, out_cat))

    assert out_poi.shape == (S, B, num_poi)
    assert out_time.shape == (S, B, 1)
    assert out_cat.shape == (S, B, num_cat)

    ref_poi, ref_time, ref_cat = reference_forward(src, src_mask, params)
    for got, ref in ((out_poi, ref_poi), (out_time, ref_time), (out_cat, ref_cat)):
        assert jnp.all(jnp.isfinite(got))
        err = float(jnp.max(jnp.abs(got - ref)))
        assert err < 5e-2, f"max abs error vs f32 reference: {err}"

    print("KERNEL_OK")
</pallas_src>

<mosaic_0001>
module attributes {stable_mosaic.version = 11 : i64} {
  func.func @fused_transformer_kernel(%arg0: i32, %arg1: memref<1x8x32xf32, #tpu.memory_space<vmem>>, %arg2: memref<8x32xf32, #tpu.memory_space<vmem>>, %arg3: memref<8x8xf32, #tpu.memory_space<vmem>>, %arg4: memref<2x32x128xbf16, #tpu.memory_space<vmem>>, %arg5: memref<2x1x128xf32, #tpu.memory_space<vmem>>, %arg6: memref<2x32x32xbf16, #tpu.memory_space<vmem>>, %arg7: memref<2x1x32xf32, #tpu.memory_space<vmem>>, %arg8: memref<2x1x32xf32, #tpu.memory_space<vmem>>, %arg9: memref<2x1x32xf32, #tpu.memory_space<vmem>>, %arg10: memref<2x32x128xbf16, #tpu.memory_space<vmem>>, %arg11: memref<2x1x128xf32, #tpu.memory_space<vmem>>, %arg12: memref<2x128x32xbf16, #tpu.memory_space<vmem>>, %arg13: memref<2x1x32xf32, #tpu.memory_space<vmem>>, %arg14: memref<2x1x32xf32, #tpu.memory_space<vmem>>, %arg15: memref<2x1x32xf32, #tpu.memory_space<vmem>>, %arg16: memref<32x128xbf16, #tpu.memory_space<vmem>>, %arg17: memref<1x128xf32, #tpu.memory_space<vmem>>, %arg18: memref<1x8x128xf32, #tpu.memory_space<vmem>>) attributes {dimension_semantics = [#tpu.dimension_semantics<parallel>], iteration_bounds = array<i64: 2>, scalar_prefetch = 0 : i64, scratch_operands = 0 : i64, tpu.core_type = #tpu.core_type<tc>, window_params = [{transform_indices = @transform_0, window_bounds = array<i64: 1, 8, 32>}, {pipeline_mode = #tpu.pipeline_mode<synchronous>, transform_indices = @transform_1, window_bounds = array<i64: 8, 32>}, {pipeline_mode = #tpu.pipeline_mode<synchronous>, transform_indices = @transform_2, window_bounds = array<i64: 8, 8>}, {pipeline_mode = #tpu.pipeline_mode<synchronous>, transform_indices = @transform_3, window_bounds = array<i64: 2, 32, 128>}, {pipeline_mode = #tpu.pipeline_mode<synchronous>, transform_indices = @transform_4, window_bounds = array<i64: 2, 1, 128>}, {pipeline_mode = #tpu.pipeline_mode<synchronous>, transform_indices = @transform_5, window_bounds = array<i64: 2, 32, 32>}, {pipeline_mode = #tpu.pipeline_mode<synchronous>, transform_indices = @transform_6, window_bounds = array<i64: 2, 1, 32>}, {pipeline_mode = #tpu.pipeline_mode<synchronous>, transform_indices = @transform_7, window_bounds = array<i64: 2, 1, 32>}, {pipeline_mode = #tpu.pipeline_mode<synchronous>, transform_indices = @transform_8, window_bounds = array<i64: 2, 1, 32>}, {pipeline_mode = #tpu.pipeline_mode<synchronous>, transform_indices = @transform_9, window_bounds = array<i64: 2, 32, 128>}, {pipeline_mode = #tpu.pipeline_mode<synchronous>, transform_indices = @transform_10, window_bounds = array<i64: 2, 1, 128>}, {pipeline_mode = #tpu.pipeline_mode<synchronous>, transform_indices = @transform_11, window_bounds = array<i64: 2, 128, 32>}, {pipeline_mode = #tpu.pipeline_mode<synchronous>, transform_indices = @transform_12, window_bounds = array<i64: 2, 1, 32>}, {pipeline_mode = #tpu.pipeline_mode<synchronous>, transform_indices = @transform_13, window_bounds = array<i64: 2, 1, 32>}, {pipeline_mode = #tpu.pipeline_mode<synchronous>, transform_indices = @transform_14, window_bounds = array<i64: 2, 1, 32>}, {pipeline_mode = #tpu.pipeline_mode<synchronous>, transform_indices = @transform_15, window_bounds = array<i64: 32, 128>}, {pipeline_mode = #tpu.pipeline_mode<synchronous>, transform_indices = @transform_16, window_bounds = array<i64: 1, 128>}, {transform_indices = @transform_17, window_bounds = array<i64: 1, 8, 128>}]} {
    %c0 = arith.constant 0 : index
    %c0_0 = arith.constant 0 : index
    %c0_1 = arith.constant 0 : index
    %0 = vector.load %arg1[%c0, %c0_0, %c0_1] : memref<1x8x32xf32, #tpu.memory_space<vmem>>, vector<1x8x32xf32>
    %1 = vector.shape_cast %0 : vector<1x8x32xf32> to vector<8x32xf32>
    %cst = arith.constant 5.65685415 : f32
    %2 = vector.broadcast %cst : f32 to vector<8x32xf32>
    %3 = arith.mulf %1, %2 : vector<8x32xf32>
    %c0_2 = arith.constant 0 : index
    %c0_3 = arith.constant 0 : index
    %4 = vector.load %arg2[%c0_2, %c0_3] : memref<8x32xf32, #tpu.memory_space<vmem>>, vector<8x32xf32>
    %5 = arith.addf %3, %4 : vector<8x32xf32>
    %c0_4 = arith.constant 0 : index
    %c0_5 = arith.constant 0 : index
    %6 = vector.load %arg3[%c0_4, %c0_5] : memref<8x8xf32, #tpu.memory_space<vmem>>, vector<8x8xf32>
    %7 = arith.truncf %5 : vector<8x32xf32> to vector<8x32xbf16>
    %c0_6 = arith.constant 0 : index
    %c0_7 = arith.constant 0 : index
    %c0_8 = arith.constant 0 : index
    %8 = vector.load %arg4[%c0_6, %c0_7, %c0_8] : memref<2x32x128xbf16, #tpu.memory_space<vmem>>, vector<1x32x128xbf16>
    %9 = vector.shape_cast %8 : vector<1x32x128xbf16> to vector<32x128xbf16>
    %cst_9 = arith.constant dense<0.000000e+00> : vector<8x128xf32>
    %10 = tpu.matmul %7, %9, %cst_9 {dimension_numbers = #tpu.dot_dimension_numbers<[1], [0], [0], [1], [0, 0, 1, 1], [], []>} : vector<8x32xbf16>, vector<32x128xbf16>, vector<8x128xf32> -> vector<8x128xf32>
    %c0_10 = arith.constant 0 : index
    %c0_11 = arith.constant 0 : index
    %c0_12 = arith.constant 0 : index
    %11 = vector.load %arg5[%c0_10, %c0_11, %c0_12] : memref<2x1x128xf32, #tpu.memory_space<vmem>>, vector<1x1x128xf32>
    %12 = vector.shape_cast %11 : vector<1x1x128xf32> to vector<1x128xf32>
    %13 = vector.broadcast %12 : vector<1x128xf32> to vector<8x128xf32>
    %14 = arith.addf %10, %13 : vector<8x128xf32>
    %15 = vector.extract_strided_slice %14 {offsets = [0, 0], sizes = [8, 16], strides = [1, 1]} : vector<8x128xf32> to vector<8x16xf32>
    %16 = arith.truncf %15 : vector<8x16xf32> to vector<8x16xbf16>
    %17 = vector.extract_strided_slice %14 {offsets = [0, 32], sizes = [8, 16], strides = [1, 1]} : vector<8x128xf32> to vector<8x16xf32>
    %18 = arith.truncf %17 : vector<8x16xf32> to vector<8x16xbf16>
    %19 = vector.extract_strided_slice %14 {offsets = [0, 64], sizes = [8, 16], strides = [1, 1]} : vector<8x128xf32> to vector<8x16xf32>
    %20 = arith.truncf %19 : vector<8x16xf32> to vector<8x16xbf16>
    "tpu.trace_start"() <{level = 10 : i32, message = "sd,td->st"}> : () -> ()
    %cst_13 = arith.constant dense<0.000000e+00> : vector<8x8xf32>
    %21 = tpu.matmul %16, %18, %cst_13 {dimension_numbers = #tpu.dot_dimension_numbers<[1], [1], [0], [0], [0, 0, 1, 0], [], []>} : vector<8x16xbf16>, vector<8x16xbf16>, vector<8x8xf32> -> vector<8x8xf32>
    "tpu.trace_stop"() : () -> ()
    %22 = arith.addf %21, %6 : vector<8x8xf32>
    %cst_14 = arith.constant dense<0xFF800000> : vector<8xf32>
    %23 = vector.multi_reduction <maximumf>, %22, %cst_14 [1] : vector<8x8xf32> to vector<8xf32>
    %24 = vector.shape_cast %23 : vector<8xf32> to vector<8x1xf32>
    %25 = vector.broadcast %24 : vector<8x1xf32> to vector<8x8xf32>
    %26 = arith.subf %22, %25 : vector<8x8xf32>
    %27 = math.exp %26 : vector<8x8xf32>
    %cst_15 = arith.constant dense<0.000000e+00> : vector<8xf32>
    %28 = vector.multi_reduction <add>, %27, %cst_15 [1] : vector<8x8xf32> to vector<8xf32>
    %29 = vector.shape_cast %28 : vector<8xf32> to vector<8x1xf32>
    %30 = tpu.reciprocal %29 {approx = true} : vector<8x1xf32> -> vector<8x1xf32>
    %31 = vector.broadcast %30 : vector<8x1xf32> to vector<8x8xf32>
    %32 = arith.mulf %27, %31 : vector<8x8xf32>
    %33 = arith.truncf %32 : vector<8x8xf32> to vector<8x8xbf16>
    %cst_16 = arith.constant dense<0.000000e+00> : vector<8x16xf32>
    %34 = tpu.matmul %33, %20, %cst_16 {dimension_numbers = #tpu.dot_dimension_numbers<[1], [0], [0], [1], [0, 0, 1, 1], [], []>} : vector<8x8xbf16>, vector<8x16xbf16>, vector<8x16xf32> -> vector<8x16xf32>
    %35 = vector.extract_strided_slice %14 {offsets = [0, 16], sizes = [8, 16], strides = [1, 1]} : vector<8x128xf32> to vector<8x16xf32>
    %36 = arith.truncf %35 : vector<8x16xf32> to vector<8x16xbf16>
    %37 = vector.extract_strided_slice %14 {offsets = [0, 48], sizes = [8, 16], strides = [1, 1]} : vector<8x128xf32> to vector<8x16xf32>
    %38 = arith.truncf %37 : vector<8x16xf32> to vector<8x16xbf16>
    %39 = vector.extract_strided_slice %14 {offsets = [0, 80], sizes = [8, 16], strides = [1, 1]} : vector<8x128xf32> to vector<8x16xf32>
    %40 = arith.truncf %39 : vector<8x16xf32> to vector<8x16xbf16>
    "tpu.trace_start"() <{level = 10 : i32, message = "sd,td->st"}> : () -> ()
    %cst_17 = arith.constant dense<0.000000e+00> : vector<8x8xf32>
    %41 = tpu.matmul %36, %38, %cst_17 {dimension_numbers = #tpu.dot_dimension_numbers<[1], [1], [0], [0], [0, 0, 1, 0], [], []>} : vector<8x16xbf16>, vector<8x16xbf16>, vector<8x8xf32> -> vector<8x8xf32>
    "tpu.trace_stop"() : () -> ()
    %42 = arith.addf %41, %6 : vector<8x8xf32>
    %cst_18 = arith.constant dense<0xFF800000> : vector<8xf32>
    %43 = vector.multi_reduction <maximumf>, %42, %cst_18 [1] : vector<8x8xf32> to vector<8xf32>
    %44 = vector.shape_cast %43 : vector<8xf32> to vector<8x1xf32>
    %45 = vector.broadcast %44 : vector<8x1xf32> to vector<8x8xf32>
    %46 = arith.subf %42, %45 : vector<8x8xf32>
    %47 = math.exp %46 : vector<8x8xf32>
    %cst_19 = arith.constant dense<0.000000e+00> : vector<8xf32>
    %48 = vector.multi_reduction <add>, %47, %cst_19 [1] : vector<8x8xf32> to vector<8xf32>
    %49 = vector.shape_cast %48 : vector<8xf32> to vector<8x1xf32>
    %50 = tpu.reciprocal %49 {approx = true} : vector<8x1xf32> -> vector<8x1xf32>
    %51 = vector.broadcast %50 : vector<8x1xf32> to vector<8x8xf32>
    %52 = arith.mulf %47, %51 : vector<8x8xf32>
    %53 = arith.truncf %52 : vector<8x8xf32> to vector<8x8xbf16>
    %cst_20 = arith.constant dense<0.000000e+00> : vector<8x16xf32>
    %54 = tpu.matmul %53, %40, %cst_20 {dimension_numbers = #tpu.dot_dimension_numbers<[1], [0], [0], [1], [0, 0, 1, 1], [], []>} : vector<8x8xbf16>, vector<8x16xbf16>, vector<8x16xf32> -> vector<8x16xf32>
    %55 = tpu.concatenate %34, %54 in 1 : vector<8x16xf32>, vector<8x16xf32> -> vector<8x32xf32>
    %56 = arith.truncf %55 : vector<8x32xf32> to vector<8x32xbf16>
    %c0_21 = arith.constant 0 : index
    %c0_22 = arith.constant 0 : index
    %c0_23 = arith.constant 0 : index
    %57 = vector.load %arg6[%c0_21, %c0_22, %c0_23] : memref<2x32x32xbf16, #tpu.memory_space<vmem>>, vector<1x32x32xbf16>
    %58 = vector.shape_cast %57 : vector<1x32x32xbf16> to vector<32x32xbf16>
    %cst_24 = arith.constant dense<0.000000e+00> : vector<8x32xf32>
    %59 = tpu.matmul %56, %58, %cst_24 {dimension_numbers = #tpu.dot_dimension_numbers<[1], [0], [0], [1], [0, 0, 1, 1], [], []>} : vector<8x32xbf16>, vector<32x32xbf16>, vector<8x32xf32> -> vector<8x32xf32>
    %c0_25 = arith.constant 0 : index
    %c0_26 = arith.constant 0 : index
    %c0_27 = arith.constant 0 : index
    %60 = vector.load %arg7[%c0_25, %c0_26, %c0_27] : memref<2x1x32xf32, #tpu.memory_space<vmem>>, vector<1x1x32xf32>
    %61 = vector.shape_cast %60 : vector<1x1x32xf32> to vector<1x32xf32>
    %62 = vector.broadcast %61 : vector<1x32xf32> to vector<8x32xf32>
    %63 = arith.addf %59, %62 : vector<8x32xf32>
    %64 = arith.addf %5, %63 : vector<8x32xf32>
    %c0_28 = arith.constant 0 : index
    %c0_29 = arith.constant 0 : index
    %c0_30 = arith.constant 0 : index
    %65 = vector.load %arg8[%c0_28, %c0_29, %c0_30] : memref<2x1x32xf32, #tpu.memory_space<vmem>>, vector<1x1x32xf32>
    %66 = vector.shape_cast %65 : vector<1x1x32xf32> to vector<1x32xf32>
    %c0_31 = arith.constant 0 : index
    %c0_32 = arith.constant 0 : index
    %c0_33 = arith.constant 0 : index
    %67 = vector.load %arg9[%c0_31, %c0_32, %c0_33] : memref<2x1x32xf32, #tpu.memory_space<vmem>>, vector<1x1x32xf32>
    %68 = vector.shape_cast %67 : vector<1x1x32xf32> to vector<1x32xf32>
    %cst_34 = arith.constant dense<0.000000e+00> : vector<8xf32>
    %69 = vector.multi_reduction <add>, %64, %cst_34 [1] : vector<8x32xf32> to vector<8xf32>
    %70 = vector.shape_cast %69 : vector<8xf32> to vector<8x1xf32>
    %cst_35 = arith.constant 3.200000e+01 : f32
    %71 = vector.broadcast %cst_35 : f32 to vector<8x1xf32>
    %72 = arith.divf %70, %71 : vector<8x1xf32>
    %73 = arith.mulf %64, %64 : vector<8x32xf32>
    %cst_36 = arith.constant dense<0.000000e+00> : vector<8xf32>
    %74 = vector.multi_reduction <add>, %73, %cst_36 [1] : vector<8x32xf32> to vector<8xf32>
    %75 = vector.shape_cast %74 : vector<8xf32> to vector<8x1xf32>
    %cst_37 = arith.constant 3.200000e+01 : f32
    %76 = vector.broadcast %cst_37 : f32 to vector<8x1xf32>
    %77 = arith.divf %75, %76 : vector<8x1xf32>
    %78 = arith.mulf %72, %72 : vector<8x1xf32>
    %79 = arith.subf %77, %78 : vector<8x1xf32>
    %cst_38 = arith.constant 0.000000e+00 : f32
    %80 = vector.broadcast %cst_38 : f32 to vector<8x1xf32>
    %81 = arith.maximumf %79, %80 : vector<8x1xf32>
    %82 = vector.broadcast %72 : vector<8x1xf32> to vector<8x32xf32>
    %83 = arith.subf %64, %82 : vector<8x32xf32>
    %cst_39 = arith.constant 9.99999974E-6 : f32
    %84 = vector.broadcast %cst_39 : f32 to vector<8x1xf32>
    %85 = arith.addf %81, %84 : vector<8x1xf32>
    %86 = math.rsqrt %85 : vector<8x1xf32>
    %87 = vector.broadcast %86 : vector<8x1xf32> to vector<8x32xf32>
    %88 = arith.mulf %83, %87 : vector<8x32xf32>
    %89 = vector.broadcast %66 : vector<1x32xf32> to vector<8x32xf32>
    %90 = arith.mulf %88, %89 : vector<8x32xf32>
    %91 = vector.broadcast %68 : vector<1x32xf32> to vector<8x32xf32>
    %92 = arith.addf %90, %91 : vector<8x32xf32>
    %93 = arith.truncf %92 : vector<8x32xf32> to vector<8x32xbf16>
    %c0_40 = arith.constant 0 : index
    %c0_41 = arith.constant 0 : index
    %c0_42 = arith.constant 0 : index
    %94 = vector.load %arg10[%c0_40, %c0_41, %c0_42] : memref<2x32x128xbf16, #tpu.memory_space<vmem>>, vector<1x32x128xbf16>
    %95 = vector.shape_cast %94 : vector<1x32x128xbf16> to vector<32x128xbf16>
    %cst_43 = arith.constant dense<0.000000e+00> : vector<8x128xf32>
    %96 = tpu.matmul %93, %95, %cst_43 {dimension_numbers = #tpu.dot_dimension_numbers<[1], [0], [0], [1], [0, 0, 1, 1], [], []>} : vector<8x32xbf16>, vector<32x128xbf16>, vector<8x128xf32> -> vector<8x128xf32>
    %c0_44 = arith.constant 0 : index
    %c0_45 = arith.constant 0 : index
    %c0_46 = arith.constant 0 : index
    %97 = vector.load %arg11[%c0_44, %c0_45, %c0_46] : memref<2x1x128xf32, #tpu.memory_space<vmem>>, vector<1x1x128xf32>
    %98 = vector.shape_cast %97 : vector<1x1x128xf32> to vector<1x128xf32>
    %99 = vector.broadcast %98 : vector<1x128xf32> to vector<8x128xf32>
    %100 = arith.addf %96, %99 : vector<8x128xf32>
    %cst_47 = arith.constant 0.000000e+00 : f32
    %101 = vector.broadcast %cst_47 : f32 to vector<8x128xf32>
    %102 = arith.maximumf %100, %101 : vector<8x128xf32>
    %103 = arith.truncf %102 : vector<8x128xf32> to vector<8x128xbf16>
    %c0_48 = arith.constant 0 : index
    %c0_49 = arith.constant 0 : index
    %c0_50 = arith.constant 0 : index
    %104 = vector.load %arg12[%c0_48, %c0_49, %c0_50] : memref<2x128x32xbf16, #tpu.memory_space<vmem>>, vector<1x128x32xbf16>
    %105 = vector.shape_cast %104 : vector<1x128x32xbf16> to vector<128x32xbf16>
    %cst_51 = arith.constant dense<0.000000e+00> : vector<8x32xf32>
    %106 = tpu.matmul %103, %105, %cst_51 {dimension_numbers = #tpu.dot_dimension_numbers<[1], [0], [0], [1], [0, 0, 1, 1], [], []>} : vector<8x128xbf16>, vector<128x32xbf16>, vector<8x32xf32> -> vector<8x32xf32>
    %c0_52 = arith.constant 0 : index
    %c0_53 = arith.constant 0 : index
    %c0_54 = arith.constant 0 : index
    %107 = vector.load %arg13[%c0_52, %c0_53, %c0_54] : memref<2x1x32xf32, #tpu.memory_space<vmem>>, vector<1x1x32xf32>
    %108 = vector.shape_cast %107 : vector<1x1x32xf32> to vector<1x32xf32>
    %109 = vector.broadcast %108 : vector<1x32xf32> to vector<8x32xf32>
    %110 = arith.addf %106, %109 : vector<8x32xf32>
    %111 = arith.addf %92, %110 : vector<8x32xf32>
    %c0_55 = arith.constant 0 : index
    %c0_56 = arith.constant 0 : index
    %c0_57 = arith.constant 0 : index
    %112 = vector.load %arg14[%c0_55, %c0_56, %c0_57] : memref<2x1x32xf32, #tpu.memory_space<vmem>>, vector<1x1x32xf32>
    %113 = vector.shape_cast %112 : vector<1x1x32xf32> to vector<1x32xf32>
    %c0_58 = arith.constant 0 : index
    %c0_59 = arith.constant 0 : index
    %c0_60 = arith.constant 0 : index
    %114 = vector.load %arg15[%c0_58, %c0_59, %c0_60] : memref<2x1x32xf32, #tpu.memory_space<vmem>>, vector<1x1x32xf32>
    %115 = vector.shape_cast %114 : vector<1x1x32xf32> to vector<1x32xf32>
    %cst_61 = arith.constant dense<0.000000e+00> : vector<8xf32>
    %116 = vector.multi_reduction <add>, %111, %cst_61 [1] : vector<8x32xf32> to vector<8xf32>
    %117 = vector.shape_cast %116 : vector<8xf32> to vector<8x1xf32>
    %cst_62 = arith.constant 3.200000e+01 : f32
    %118 = vector.broadcast %cst_62 : f32 to vector<8x1xf32>
    %119 = arith.divf %117, %118 : vector<8x1xf32>
    %120 = arith.mulf %111, %111 : vector<8x32xf32>
    %cst_63 = arith.constant dense<0.000000e+00> : vector<8xf32>
    %121 = vector.multi_reduction <add>, %120, %cst_63 [1] : vector<8x32xf32> to vector<8xf32>
    %122 = vector.shape_cast %121 : vector<8xf32> to vector<8x1xf32>
    %cst_64 = arith.constant 3.200000e+01 : f32
    %123 = vector.broadcast %cst_64 : f32 to vector<8x1xf32>
    %124 = arith.divf %122, %123 : vector<8x1xf32>
    %125 = arith.mulf %119, %119 : vector<8x1xf32>
    %126 = arith.subf %124, %125 : vector<8x1xf32>
    %cst_65 = arith.constant 0.000000e+00 : f32
    %127 = vector.broadcast %cst_65 : f32 to vector<8x1xf32>
    %128 = arith.maximumf %126, %127 : vector<8x1xf32>
    %129 = vector.broadcast %119 : vector<8x1xf32> to vector<8x32xf32>
    %130 = arith.subf %111, %129 : vector<8x32xf32>
    %cst_66 = arith.constant 9.99999974E-6 : f32
    %131 = vector.broadcast %cst_66 : f32 to vector<8x1xf32>
    %132 = arith.addf %128, %131 : vector<8x1xf32>
    %133 = math.rsqrt %132 : vector<8x1xf32>
    %134 = vector.broadcast %133 : vector<8x1xf32> to vector<8x32xf32>
    %135 = arith.mulf %130, %134 : vector<8x32xf32>
    %136 = vector.broadcast %113 : vector<1x32xf32> to vector<8x32xf32>
    %137 = arith.mulf %135, %136 : vector<8x32xf32>
    %138 = vector.broadcast %115 : vector<1x32xf32> to vector<8x32xf32>
    %139 = arith.addf %137, %138 : vector<8x32xf32>
    %140 = arith.truncf %139 : vector<8x32xf32> to vector<8x32xbf16>
    %c1 = arith.constant 1 : index
    %c0_67 = arith.constant 0 : index
    %c0_68 = arith.constant 0 : index
    %141 = vector.load %arg4[%c1, %c0_67, %c0_68] : memref<2x32x128xbf16, #tpu.memory_space<vmem>>, vector<1x32x128xbf16>
    %142 = vector.shape_cast %141 : vector<1x32x128xbf16> to vector<32x128xbf16>
    %cst_69 = arith.constant dense<0.000000e+00> : vector<8x128xf32>
    %143 = tpu.matmul %140, %142, %cst_69 {dimension_numbers = #tpu.dot_dimension_numbers<[1], [0], [0], [1], [0, 0, 1, 1], [], []>} : vector<8x32xbf16>, vector<32x128xbf16>, vector<8x128xf32> -> vector<8x128xf32>
    %c1_70 = arith.constant 1 : index
    %c0_71 = arith.constant 0 : index
    %c0_72 = arith.constant 0 : index
    %144 = vector.load %arg5[%c1_70, %c0_71, %c0_72] : memref<2x1x128xf32, #tpu.memory_space<vmem>>, vector<1x1x128xf32>
    %145 = vector.shape_cast %144 : vector<1x1x128xf32> to vector<1x128xf32>
    %146 = vector.broadcast %145 : vector<1x128xf32> to vector<8x128xf32>
    %147 = arith.addf %143, %146 : vector<8x128xf32>
    %148 = vector.extract_strided_slice %147 {offsets = [0, 0], sizes = [8, 16], strides = [1, 1]} : vector<8x128xf32> to vector<8x16xf32>
    %149 = arith.truncf %148 : vector<8x16xf32> to vector<8x16xbf16>
    %150 = vector.extract_strided_slice %147 {offsets = [0, 32], sizes = [8, 16], strides = [1, 1]} : vector<8x128xf32> to vector<8x16xf32>
    %151 = arith.truncf %150 : vector<8x16xf32> to vector<8x16xbf16>
    %152 = vector.extract_strided_slice %147 {offsets = [0, 64], sizes = [8, 16], strides = [1, 1]} : vector<8x128xf32> to vector<8x16xf32>
    %153 = arith.truncf %152 : vector<8x16xf32> to vector<8x16xbf16>
    "tpu.trace_start"() <{level = 10 : i32, message = "sd,td->st"}> : () -> ()
    %cst_73 = arith.constant dense<0.000000e+00> : vector<8x8xf32>
    %154 = tpu.matmul %149, %151, %cst_73 {dimension_numbers = #tpu.dot_dimension_numbers<[1], [1], [0], [0], [0, 0, 1, 0], [], []>} : vector<8x16xbf16>, vector<8x16xbf16>, vector<8x8xf32> -> vector<8x8xf32>
    "tpu.trace_stop"() : () -> ()
    %155 = arith.addf %154, %6 : vector<8x8xf32>
    %cst_74 = arith.constant dense<0xFF800000> : vector<8xf32>
    %156 = vector.multi_reduction <maximumf>, %155, %cst_74 [1] : vector<8x8xf32> to vector<8xf32>
    %157 = vector.shape_cast %156 : vector<8xf32> to vector<8x1xf32>
    %158 = vector.broadcast %157 : vector<8x1xf32> to vector<8x8xf32>
    %159 = arith.subf %155, %158 : vector<8x8xf32>
    %160 = math.exp %159 : vector<8x8xf32>
    %cst_75 = arith.constant dense<0.000000e+00> : vector<8xf32>
    %161 = vector.multi_reduction <add>, %160, %cst_75 [1] : vector<8x8xf32> to vector<8xf32>
    %162 = vector.shape_cast %161 : vector<8xf32> to vector<8x1xf32>
    %163 = tpu.reciprocal %162 {approx = true} : vector<8x1xf32> -> vector<8x1xf32>
    %164 = vector.broadcast %163 : vector<8x1xf32> to vector<8x8xf32>
    %165 = arith.mulf %160, %164 : vector<8x8xf32>
    %166 = arith.truncf %165 : vector<8x8xf32> to vector<8x8xbf16>
    %cst_76 = arith.constant dense<0.000000e+00> : vector<8x16xf32>
    %167 = tpu.matmul %166, %153, %cst_76 {dimension_numbers = #tpu.dot_dimension_numbers<[1], [0], [0], [1], [0, 0, 1, 1], [], []>} : vector<8x8xbf16>, vector<8x16xbf16>, vector<8x16xf32> -> vector<8x16xf32>
    %168 = vector.extract_strided_slice %147 {offsets = [0, 16], sizes = [8, 16], strides = [1, 1]} : vector<8x128xf32> to vector<8x16xf32>
    %169 = arith.truncf %168 : vector<8x16xf32> to vector<8x16xbf16>
    %170 = vector.extract_strided_slice %147 {offsets = [0, 48], sizes = [8, 16], strides = [1, 1]} : vector<8x128xf32> to vector<8x16xf32>
    %171 = arith.truncf %170 : vector<8x16xf32> to vector<8x16xbf16>
    %172 = vector.extract_strided_slice %147 {offsets = [0, 80], sizes = [8, 16], strides = [1, 1]} : vector<8x128xf32> to vector<8x16xf32>
    %173 = arith.truncf %172 : vector<8x16xf32> to vector<8x16xbf16>
    "tpu.trace_start"() <{level = 10 : i32, message = "sd,td->st"}> : () -> ()
    %cst_77 = arith.constant dense<0.000000e+00> : vector<8x8xf32>
    %174 = tpu.matmul %169, %171, %cst_77 {dimension_numbers = #tpu.dot_dimension_numbers<[1], [1], [0], [0], [0, 0, 1, 0], [], []>} : vector<8x16xbf16>, vector<8x16xbf16>, vector<8x8xf32> -> vector<8x8xf32>
    "tpu.trace_stop"() : () -> ()
    %175 = arith.addf %174, %6 : vector<8x8xf32>
    %cst_78 = arith.constant dense<0xFF800000> : vector<8xf32>
    %176 = vector.multi_reduction <maximumf>, %175, %cst_78 [1] : vector<8x8xf32> to vector<8xf32>
    %177 = vector.shape_cast %176 : vector<8xf32> to vector<8x1xf32>
    %178 = vector.broadcast %177 : vector<8x1xf32> to vector<8x8xf32>
    %179 = arith.subf %175, %178 : vector<8x8xf32>
    %180 = math.exp %179 : vector<8x8xf32>
    %cst_79 = arith.constant dense<0.000000e+00> : vector<8xf32>
    %181 = vector.multi_reduction <add>, %180, %cst_79 [1] : vector<8x8xf32> to vector<8xf32>
    %182 = vector.shape_cast %181 : vector<8xf32> to vector<8x1xf32>
    %183 = tpu.reciprocal %182 {approx = true} : vector<8x1xf32> -> vector<8x1xf32>
    %184 = vector.broadcast %183 : vector<8x1xf32> to vector<8x8xf32>
    %185 = arith.mulf %180, %184 : vector<8x8xf32>
    %186 = arith.truncf %185 : vector<8x8xf32> to vector<8x8xbf16>
    %cst_80 = arith.constant dense<0.000000e+00> : vector<8x16xf32>
    %187 = tpu.matmul %186, %173, %cst_80 {dimension_numbers = #tpu.dot_dimension_numbers<[1], [0], [0], [1], [0, 0, 1, 1], [], []>} : vector<8x8xbf16>, vector<8x16xbf16>, vector<8x16xf32> -> vector<8x16xf32>
    %188 = tpu.concatenate %167, %187 in 1 : vector<8x16xf32>, vector<8x16xf32> -> vector<8x32xf32>
    %189 = arith.truncf %188 : vector<8x32xf32> to vector<8x32xbf16>
    %c1_81 = arith.constant 1 : index
    %c0_82 = arith.constant 0 : index
    %c0_83 = arith.constant 0 : index
    %190 = vector.load %arg6[%c1_81, %c0_82, %c0_83] : memref<2x32x32xbf16, #tpu.memory_space<vmem>>, vector<1x32x32xbf16>
    %191 = vector.shape_cast %190 : vector<1x32x32xbf16> to vector<32x32xbf16>
    %cst_84 = arith.constant dense<0.000000e+00> : vector<8x32xf32>
    %192 = tpu.matmul %189, %191, %cst_84 {dimension_numbers = #tpu.dot_dimension_numbers<[1], [0], [0], [1], [0, 0, 1, 1], [], []>} : vector<8x32xbf16>, vector<32x32xbf16>, vector<8x32xf32> -> vector<8x32xf32>
    %c1_85 = arith.constant 1 : index
    %c0_86 = arith.constant 0 : index
    %c0_87 = arith.constant 0 : index
    %193 = vector.load %arg7[%c1_85, %c0_86, %c0_87] : memref<2x1x32xf32, #tpu.memory_space<vmem>>, vector<1x1x32xf32>
    %194 = vector.shape_cast %193 : vector<1x1x32xf32> to vector<1x32xf32>
    %195 = vector.broadcast %194 : vector<1x32xf32> to vector<8x32xf32>
    %196 = arith.addf %192, %195 : vector<8x32xf32>
    %197 = arith.addf %139, %196 : vector<8x32xf32>
    %c1_88 = arith.constant 1 : index
    %c0_89 = arith.constant 0 : index
    %c0_90 = arith.constant 0 : index
    %198 = vector.load %arg8[%c1_88, %c0_89, %c0_90] : memref<2x1x32xf32, #tpu.memory_space<vmem>>, vector<1x1x32xf32>
    %199 = vector.shape_cast %198 : vector<1x1x32xf32> to vector<1x32xf32>
    %c1_91 = arith.constant 1 : index
    %c0_92 = arith.constant 0 : index
    %c0_93 = arith.constant 0 : index
    %200 = vector.load %arg9[%c1_91, %c0_92, %c0_93] : memref<2x1x32xf32, #tpu.memory_space<vmem>>, vector<1x1x32xf32>
    %201 = vector.shape_cast %200 : vector<1x1x32xf32> to vector<1x32xf32>
    %cst_94 = arith.constant dense<0.000000e+00> : vector<8xf32>
    %202 = vector.multi_reduction <add>, %197, %cst_94 [1] : vector<8x32xf32> to vector<8xf32>
    %203 = vector.shape_cast %202 : vector<8xf32> to vector<8x1xf32>
    %cst_95 = arith.constant 3.200000e+01 : f32
    %204 = vector.broadcast %cst_95 : f32 to vector<8x1xf32>
    %205 = arith.divf %203, %204 : vector<8x1xf32>
    %206 = arith.mulf %197, %197 : vector<8x32xf32>
    %cst_96 = arith.constant dense<0.000000e+00> : vector<8xf32>
    %207 = vector.multi_reduction <add>, %206, %cst_96 [1] : vector<8x32xf32> to vector<8xf32>
    %208 = vector.shape_cast %207 : vector<8xf32> to vector<8x1xf32>
    %cst_97 = arith.constant 3.200000e+01 : f32
    %209 = vector.broadcast %cst_97 : f32 to vector<8x1xf32>
    %210 = arith.divf %208, %209 : vector<8x1xf32>
    %211 = arith.mulf %205, %205 : vector<8x1xf32>
    %212 = arith.subf %210, %211 : vector<8x1xf32>
    %cst_98 = arith.constant 0.000000e+00 : f32
    %213 = vector.broadcast %cst_98 : f32 to vector<8x1xf32>
    %214 = arith.maximumf %212, %213 : vector<8x1xf32>
    %215 = vector.broadcast %205 : vector<8x1xf32> to vector<8x32xf32>
    %216 = arith.subf %197, %215 : vector<8x32xf32>
    %cst_99 = arith.constant 9.99999974E-6 : f32
    %217 = vector.broadcast %cst_99 : f32 to vector<8x1xf32>
    %218 = arith.addf %214, %217 : vector<8x1xf32>
    %219 = math.rsqrt %218 : vector<8x1xf32>
    %220 = vector.broadcast %219 : vector<8x1xf32> to vector<8x32xf32>
    %221 = arith.mulf %216, %220 : vector<8x32xf32>
    %222 = vector.broadcast %199 : vector<1x32xf32> to vector<8x32xf32>
    %223 = arith.mulf %221, %222 : vector<8x32xf32>
    %224 = vector.broadcast %201 : vector<1x32xf32> to vector<8x32xf32>
    %225 = arith.addf %223, %224 : vector<8x32xf32>
    %226 = arith.truncf %225 : vector<8x32xf32> to vector<8x32xbf16>
    %c1_100 = arith.constant 1 : index
    %c0_101 = arith.constant 0 : index
    %c0_102 = arith.constant 0 : index
    %227 = vector.load %arg10[%c1_100, %c0_101, %c0_102] : memref<2x32x128xbf16, #tpu.memory_space<vmem>>, vector<1x32x128xbf16>
    %228 = vector.shape_cast %227 : vector<1x32x128xbf16> to vector<32x128xbf16>
    %cst_103 = arith.constant dense<0.000000e+00> : vector<8x128xf32>
    %229 = tpu.matmul %226, %228, %cst_103 {dimension_numbers = #tpu.dot_dimension_numbers<[1], [0], [0], [1], [0, 0, 1, 1], [], []>} : vector<8x32xbf16>, vector<32x128xbf16>, vector<8x128xf32> -> vector<8x128xf32>
    %c1_104 = arith.constant 1 : index
    %c0_105 = arith.constant 0 : index
    %c0_106 = arith.constant 0 : index
    %230 = vector.load %arg11[%c1_104, %c0_105, %c0_106] : memref<2x1x128xf32, #tpu.memory_space<vmem>>, vector<1x1x128xf32>
    %231 = vector.shape_cast %230 : vector<1x1x128xf32> to vector<1x128xf32>
    %232 = vector.broadcast %231 : vector<1x128xf32> to vector<8x128xf32>
    %233 = arith.addf %229, %232 : vector<8x128xf32>
    %cst_107 = arith.constant 0.000000e+00 : f32
    %234 = vector.broadcast %cst_107 : f32 to vector<8x128xf32>
    %235 = arith.maximumf %233, %234 : vector<8x128xf32>
    %236 = arith.truncf %235 : vector<8x128xf32> to vector<8x128xbf16>
    %c1_108 = arith.constant 1 : index
    %c0_109 = arith.constant 0 : index
    %c0_110 = arith.constant 0 : index
    %237 = vector.load %arg12[%c1_108, %c0_109, %c0_110] : memref<2x128x32xbf16, #tpu.memory_space<vmem>>, vector<1x128x32xbf16>
    %238 = vector.shape_cast %237 : vector<1x128x32xbf16> to vector<128x32xbf16>
    %cst_111 = arith.constant dense<0.000000e+00> : vector<8x32xf32>
    %239 = tpu.matmul %236, %238, %cst_111 {dimension_numbers = #tpu.dot_dimension_numbers<[1], [0], [0], [1], [0, 0, 1, 1], [], []>} : vector<8x128xbf16>, vector<128x32xbf16>, vector<8x32xf32> -> vector<8x32xf32>
    %c1_112 = arith.constant 1 : index
    %c0_113 = arith.constant 0 : index
    %c0_114 = arith.constant 0 : index
    %240 = vector.load %arg13[%c1_112, %c0_113, %c0_114] : memref<2x1x32xf32, #tpu.memory_space<vmem>>, vector<1x1x32xf32>
    %241 = vector.shape_cast %240 : vector<1x1x32xf32> to vector<1x32xf32>
    %242 = vector.broadcast %241 : vector<1x32xf32> to vector<8x32xf32>
    %243 = arith.addf %239, %242 : vector<8x32xf32>
    %244 = arith.addf %225, %243 : vector<8x32xf32>
    %c1_115 = arith.constant 1 : index
    %c0_116 = arith.constant 0 : index
    %c0_117 = arith.constant 0 : index
    %245 = vector.load %arg14[%c1_115, %c0_116, %c0_117] : memref<2x1x32xf32, #tpu.memory_space<vmem>>, vector<1x1x32xf32>
    %246 = vector.shape_cast %245 : vector<1x1x32xf32> to vector<1x32xf32>
    %c1_118 = arith.constant 1 : index
    %c0_119 = arith.constant 0 : index
    %c0_120 = arith.constant 0 : index
    %247 = vector.load %arg15[%c1_118, %c0_119, %c0_120] : memref<2x1x32xf32, #tpu.memory_space<vmem>>, vector<1x1x32xf32>
    %248 = vector.shape_cast %247 : vector<1x1x32xf32> to vector<1x32xf32>
    %cst_121 = arith.constant dense<0.000000e+00> : vector<8xf32>
    %249 = vector.multi_reduction <add>, %244, %cst_121 [1] : vector<8x32xf32> to vector<8xf32>
    %250 = vector.shape_cast %249 : vector<8xf32> to vector<8x1xf32>
    %cst_122 = arith.constant 3.200000e+01 : f32
    %251 = vector.broadcast %cst_122 : f32 to vector<8x1xf32>
    %252 = arith.divf %250, %251 : vector<8x1xf32>
    %253 = arith.mulf %244, %244 : vector<8x32xf32>
    %cst_123 = arith.constant dense<0.000000e+00> : vector<8xf32>
    %254 = vector.multi_reduction <add>, %253, %cst_123 [1] : vector<8x32xf32> to vector<8xf32>
    %255 = vector.shape_cast %254 : vector<8xf32> to vector<8x1xf32>
    %cst_124 = arith.constant 3.200000e+01 : f32
    %256 = vector.broadcast %cst_124 : f32 to vector<8x1xf32>
    %257 = arith.divf %255, %256 : vector<8x1xf32>
    %258 = arith.mulf %252, %252 : vector<8x1xf32>
    %259 = arith.subf %257, %258 : vector<8x1xf32>
    %cst_125 = arith.constant 0.000000e+00 : f32
    %260 = vector.broadcast %cst_125 : f32 to vector<8x1xf32>
    %261 = arith.maximumf %259, %260 : vector<8x1xf32>
    %262 = vector.broadcast %252 : vector<8x1xf32> to vector<8x32xf32>
    %263 = arith.subf %244, %262 : vector<8x32xf32>
    %cst_126 = arith.constant 9.99999974E-6 : f32
    %264 = vector.broadcast %cst_126 : f32 to vector<8x1xf32>
    %265 = arith.addf %261, %264 : vector<8x1xf32>
    %266 = math.rsqrt %265 : vector<8x1xf32>
    %267 = vector.broadcast %266 : vector<8x1xf32> to vector<8x32xf32>
    %268 = arith.mulf %263, %267 : vector<8x32xf32>
    %269 = vector.broadcast %246 : vector<1x32xf32> to vector<8x32xf32>
    %270 = arith.mulf %268, %269 : vector<8x32xf32>
    %271 = vector.broadcast %248 : vector<1x32xf32> to vector<8x32xf32>
    %272 = arith.addf %270, %271 : vector<8x32xf32>
    %273 = arith.truncf %272 : vector<8x32xf32> to vector<8x32xbf16>
    %c0_127 = arith.constant 0 : index
    %c0_128 = arith.constant 0 : index
    %274 = vector.load %arg16[%c0_127, %c0_128] : memref<32x128xbf16, #tpu.memory_space<vmem>>, vector<32x128xbf16>
    %cst_129 = arith.constant dense<0.000000e+00> : vector<8x128xf32>
    %275 = tpu.matmul %273, %274, %cst_129 {dimension_numbers = #tpu.dot_dimension_numbers<[1], [0], [0], [1], [0, 0, 1, 1], [], []>} : vector<8x32xbf16>, vector<32x128xbf16>, vector<8x128xf32> -> vector<8x128xf32>
    %c0_130 = arith.constant 0 : index
    %c0_131 = arith.constant 0 : index
    %276 = vector.load %arg17[%c0_130, %c0_131] : memref<1x128xf32, #tpu.memory_space<vmem>>, vector<1x128xf32>
    %277 = vector.broadcast %276 : vector<1x128xf32> to vector<8x128xf32>
    %278 = arith.addf %275, %277 : vector<8x128xf32>
    %c0_132 = arith.constant 0 : index
    %c0_133 = arith.constant 0 : index
    %c0_134 = arith.constant 0 : index
    %279 = vector.load %arg18[%c0_132, %c0_133, %c0_134] : memref<1x8x128xf32, #tpu.memory_space<vmem>>, vector<1x8x128xf32>
    %280 = vector.shape_cast %279 : vector<1x8x128xf32> to vector<8x128xf32>
    %281 = vector.shape_cast %278 : vector<8x128xf32> to vector<1x8x128xf32>
    tpu.vector_store %arg18[%c0_132, %c0_133, %c0_134], %281 {strides = array<i32>} : memref<1x8x128xf32, #tpu.memory_space<vmem>>, vector<1x8x128xf32>,
    return
  }
  func.func @transform_0(%arg0: i32) -> (i32, i32, i32) {
    %c0_i32 = arith.constant 0 : i32
    %c0_i32_0 = arith.constant 0 : i32
    %c0_i32_1 = arith.constant 0 : i32
    return %arg0, %c0_i32, %c0_i32_0 : i32, i32, i32
  }
  func.func @transform_1(%arg0: i32) -> (i32, i32) {
    %c0_i32 = arith.constant 0 : i32
    %c0_i32_0 = arith.constant 0 : i32
    %c0_i32_1 = arith.constant 0 : i32
    return %c0_i32, %c0_i32_0 : i32, i32
  }
  func.func @transform_2(%arg0: i32) -> (i32, i32) {
    %c0_i32 = arith.constant 0 : i32
    %c0_i32_0 = arith.constant 0 : i32
    %c0_i32_1 = arith.constant 0 : i32
    return %c0_i32, %c0_i32_0 : i32, i32
  }
  func.func @transform_3(%arg0: i32) -> (i32, i32, i32) {
    %c0_i32 = arith.constant 0 : i32
    %c0_i32_0 = arith.constant 0 : i32
    %c0_i32_1 = arith.constant 0 : i32
    %c0_i32_2 = arith.constant 0 : i32
    return %c0_i32, %c0_i32_0, %c0_i32_1 : i32, i32, i32
  }
  func.func @transform_4(%arg0: i32) -> (i32, i32, i32) {
    %c0_i32 = arith.constant 0 : i32
    %c0_i32_0 = arith.constant 0 : i32
    %c0_i32_1 = arith.constant 0 : i32
    %c0_i32_2 = arith.constant 0 : i32
    return %c0_i32, %c0_i32_0, %c0_i32_1 : i32, i32, i32
  }
  func.func @transform_5(%arg0: i32) -> (i32, i32, i32) {
    %c0_i32 = arith.constant 0 : i32
    %c0_i32_0 = arith.constant 0 : i32
    %c0_i32_1 = arith.constant 0 : i32
    %c0_i32_2 = arith.constant 0 : i32
    return %c0_i32, %c0_i32_0, %c0_i32_1 : i32, i32, i32
  }
  func.func @transform_6(%arg0: i32) -> (i32, i32, i32) {
    %c0_i32 = arith.constant 0 : i32
    %c0_i32_0 = arith.constant 0 : i32
    %c0_i32_1 = arith.constant 0 : i32
    %c0_i32_2 = arith.constant 0 : i32
    return %c0_i32, %c0_i32_0, %c0_i32_1 : i32, i32, i32
  }
  func.func @transform_7(%arg0: i32) -> (i32, i32, i32) {
    %c0_i32 = arith.constant 0 : i32
    %c0_i32_0 = arith.constant 0 : i32
    %c0_i32_1 = arith.constant 0 : i32
    %c0_i32_2 = arith.constant 0 : i32
    return %c0_i32, %c0_i32_0, %c0_i32_1 : i32, i32, i32
  }
  func.func @transform_8(%arg0: i32) -> (i32, i32, i32) {
    %c0_i32 = arith.constant 0 : i32
    %c0_i32_0 = arith.constant 0 : i32
    %c0_i32_1 = arith.constant 0 : i32
    %c0_i32_2 = arith.constant 0 : i32
    return %c0_i32, %c0_i32_0, %c0_i32_1 : i32, i32, i32
  }
  func.func @transform_9(%arg0: i32) -> (i32, i32, i32) {
    %c0_i32 = arith.constant 0 : i32
    %c0_i32_0 = arith.constant 0 : i32
    %c0_i32_1 = arith.constant 0 : i32
    %c0_i32_2 = arith.constant 0 : i32
    return %c0_i32, %c0_i32_0, %c0_i32_1 : i32, i32, i32
  }
  func.func @transform_10(%arg0: i32) -> (i32, i32, i32) {
    %c0_i32 = arith.constant 0 : i32
    %c0_i32_0 = arith.constant 0 : i32
    %c0_i32_1 = arith.constant 0 : i32
    %c0_i32_2 = arith.constant 0 : i32
    return %c0_i32, %c0_i32_0, %c0_i32_1 : i32, i32, i32
  }
  func.func @transform_11(%arg0: i32) -> (i32, i32, i32) {
    %c0_i32 = arith.constant 0 : i32
    %c0_i32_0 = arith.constant 0 : i32
    %c0_i32_1 = arith.constant 0 : i32
    %c0_i32_2 = arith.constant 0 : i32
    return %c0_i32, %c0_i32_0, %c0_i32_1 : i32, i32, i32
  }
  func.func @transform_12(%arg0: i32) -> (i32, i32, i32) {
    %c0_i32 = arith.constant 0 : i32
    %c0_i32_0 = arith.constant 0 : i32
    %c0_i32_1 = arith.constant 0 : i32
    %c0_i32_2 = arith.constant 0 : i32
    return %c0_i32, %c0_i32_0, %c0_i32_1 : i32, i32, i32
  }
  func.func @transform_13(%arg0: i32) -> (i32, i32, i32) {
    %c0_i32 = arith.constant 0 : i32
    %c0_i32_0 = arith.constant 0 : i32
    %c0_i32_1 = arith.constant 0 : i32
    %c0_i32_2 = arith.constant 0 : i32
    return %c0_i32, %c0_i32_0, %c0_i32_1 : i32, i32, i32
  }
  func.func @transform_14(%arg0: i32) -> (i32, i32, i32) {
    %c0_i32 = arith.constant 0 : i32
    %c0_i32_0 = arith.constant 0 : i32
    %c0_i32_1 = arith.constant 0 : i32
    %c0_i32_2 = arith.constant 0 : i32
    return %c0_i32, %c0_i32_0, %c0_i32_1 : i32, i32, i32
  }
  func.func @transform_15(%arg0: i32) -> (i32, i32) {
    %c0_i32 = arith.constant 0 : i32
    %c0_i32_0 = arith.constant 0 : i32
    %c0_i32_1 = arith.constant 0 : i32
    return %c0_i32, %c0_i32_0 : i32, i32
  }
  func.func @transform_16(%arg0: i32) -> (i32, i32) {
    %c0_i32 = arith.constant 0 : i32
    %c0_i32_0 = arith.constant 0 : i32
    %c0_i32_1 = arith.constant 0 : i32
    return %c0_i32, %c0_i32_0 : i32, i32
  }
  func.func @transform_17(%arg0: i32) -> (i32, i32, i32) {
    %c0_i32 = arith.constant 0 : i32
    %c0_i32_0 = arith.constant 0 : i32
    %c0_i32_1 = arith.constant 0 : i32
    return %arg0, %c0_i32, %c0_i32_0 : i32, i32, i32
  }
}

</mosaic_0001>

<bundles_post_ra>
// kernel: _lambda_.1
= control target key start
LH: loop header
LB: loop body
LE: loop exit
PB: predicated region body
PF: predicated region fallthrough
CT: control target
= control target key end

     0   :  { %s3196_s0 = inlined_call_operand.vmem [shape: f32[2,8,32], index: 0, kind: input, shape index: {}]   ;;  %s3197_s1 = inlined_call_operand.hbm [shape: f32[8,32], index: 1, kind: input, shape index: {}]   ;;  %s3198_s2 = inlined_call_operand.hbm [shape: f32[8,8], index: 2, kind: input, shape index: {}]   ;;  %s3199_s3 = inlined_call_operand.vmem [shape: bf16[2,32,128], index: 3, kind: input, shape index: {}]   ;;  %s3200_s4 = inlined_call_operand.vmem [shape: f32[2,1,128], index: 4, kind: input, shape index: {}]   ;;  %s3201_s5 = inlined_call_operand.vmem [shape: bf16[2,32,32], index: 5, kind: input, shape index: {}]   ;;  %s3202_s6 = inlined_call_operand.vmem [shape: f32[2,1,32], index: 6, kind: input, shape index: {}, may-alias: {6,8,14}]   ;;  %s3203_s7 = inlined_call_operand.vmem [shape: f32[2,1,32], index: 7, kind: input, shape index: {}, may-alias: {7,13}]   ;;  %s3204_s8 = inlined_call_operand.vmem [shape: f32[2,1,32], index: 8, kind: input, shape index: {}, may-alias: {6,8,14}]   ;;  %s3205_s9 = inlined_call_operand.vmem [shape: bf16[2,32,128], index: 9, kind: input, shape index: {}]   ;;  %s3206_s10 = inlined_call_operand.hbm [shape: f32[2,1,128], index: 10, kind: input, shape index: {}]   ;;  %s3207_s11 = inlined_call_operand.hbm [shape: bf16[2,128,32], index: 11, kind: input, shape index: {}]   ;;  %s3208_s12 = inlined_call_operand.hbm [shape: f32[2,1,32], index: 12, kind: input, shape index: {}]   ;;  %s3209_s13 = inlined_call_operand.vmem [shape: f32[2,1,32], index: 13, kind: input, shape index: {}, may-alias: {7,13}]   ;;  %s3210_s14 = inlined_call_operand.vmem [shape: f32[2,1,32], index: 14, kind: input, shape index: {}, may-alias: {6,8,14}]   ;;  %s3211_s15 = inlined_call_operand.hbm [shape: bf16[32,128], index: 15, kind: input, shape index: {}]   ;;  %s3212_s16 = inlined_call_operand.vmem [shape: f32[1,128], index: 16, kind: input, shape index: {}]   ;;  %s3213_s17 = inlined_call_operand.vmem [shape: f32[2,8,128], index: 17, kind: output, shape index: {}]  }
   0x1   :  { %3222 = sst [smem:[#allocation17_spill]] %s3196_s0 }
   0x2   :  { %3223 = sst [smem:[#allocation18_spill]] %s3197_s1 }
   0x3   :  { %3224 = sst [smem:[#allocation19_spill]] %s3198_s2 }
   0x4   :  { %3225 = sst [smem:[#allocation20_spill]] %s3207_s11 }
   0x5   :  { %3226 = sst [smem:[#allocation21_spill]] %s3210_s14 }
   0x6   :  { %3227 = sst [smem:[#allocation22_spill]] %s3212_s16 }
   0x7   :  { %3228 = sst [smem:[#allocation23_spill]] %s3213_s17 }
   0x8   :  { %22 = vsyncpa [#allocation3], 0 }
   0x9   :  { %23 = vsyncpa [#allocation5], 0 }
   0xa   :  { %24 = vsyncpa [#allocation8], 0 }
   0xb   :  { %25 = vsyncpa [#allocation11], 0  ;;  %s2777_s24 = smov 0  }
   0xc LB: > { %3229 = sst [smem:[#allocation16_spill]] %s2667_s24  ;;  %s2669_s25 = smov [#allocation4]   ;;  %s2667_s24 = sphi %s2777_s24, %s31_s24  }
   0xd   : > { %s448_s26 = sshll.u32 %s2669_s25, 4  ;;  %s2783_s27 = sadd.s32 4294967295, %s2667_s24   ;;  %s2788_s26 = int_to_ptr.vmem [resolvable:$true] %s448_s26 }
   0xe   : > { %p2044_p0 = scmp.ge.s32.totalorder %s2667_s24, 1  ;;  %p424_p1 = scmp.lt.s32.totalorder %s2667_s24, 3 }
   0xf   : > { %p3217_p2 = scmp.eq.s32.totalorder %s2783_s27, 0  ;;  %s2670_s29 = smov [#allocation7]  }
  0x10   : > { %p2790_p3 = pnand %p2044_p0, %p424_p1  ;;  %s492_s0 = sshll.u32 %s2670_s29, 4  ;;  %s2796_s0 = int_to_ptr.vmem [resolvable:$true] %s492_s0 }
  0x11   : > { %s2671_s18 = smov [#allocation2]   ;;  %s2672_s1 = smov [#allocation6]  }
  0x12   : > { %s3230_s28 = scalar_select %p2790_p3, 1, 0 }
  0x13   : > { %p2366_p4 = pneg %p2790_p3  ;;  %s437_s19 = sshll.u32 %s2671_s18, 4  ;;  %s2804_s19 = int_to_ptr.vmem [resolvable:$true] %s437_s19 }
  0x14   : > { %s2806_s20 = sshll.u32 %s2672_s1, 4  ;;  %s3232_s2 = sld [smem:[#allocation19_spill]]  ;;  %s480_s20 = int_to_ptr.vmem [resolvable:$true] %s2806_s20 }
  0x15   : > { %p2800_p5 = pnand %p3217_p2, %p2366_p4 }
  0x17   : > { %p2816_p7 = pneg %p2800_p5 }
  0x1a   : > { %s2477_s23 = scalar_lea.hbm %s3232_s2, 128 }
  0x1b   : > { %p2478_p6 = scmp.ne.s32.totalorder %s3232_s2, %s2477_s23  ;;  %p2484_p10 = scmp.lt.u32.totalorder %s2477_s23, %s3232_s2 }
  0x1d   : > { %p2480_p8 = pnand %p2816_p7, %p2478_p6 }
  0x1f   : > { %p2481_p9 = pneg %p2480_p8 }
  0x21   : > { %p2486_p11 = pnand %p2484_p10, %p2481_p9 }
  0x23   : > { %2489 = shalt.err (!%p2486_p11)
}
  0x24   : > { %s2490_s21 = scalar_lea.vmem %s2788_s26, 128  ;;  %p2498_p1 = scmp.lt.s32.totalorder %s2788_s26, %s2788_s26 }
  0x25   : > { %p2491_p12 = scmp.ne.s32.totalorder %s2788_s26, %s2490_s21  ;;  %p2499_p4 = scmp.lt.s32.totalorder %s2490_s21, %s2490_s21 }
  0x27   : > { %p2493_p13 = pnand %p2491_p12, %p2816_p7  ;;  %p2500_p6 = por %p2499_p4, %p2498_p1 }
  0x29   : > { %p2494_p0 = pneg %p2493_p13 }
  0x2b   : > { %p2501_p8 = pnand %p2500_p6, %p2494_p0 }
  0x2d   : > { %2504 = shalt.err (!%p2501_p8)
}
  0x2e   : > { %2372 = dma.hbm_to_vmem [thread:$0]  (!%p2800_p5), %s3232_s2, 128, %s2788_s26, [#allocation5]  }
  0x2f   : > { %s3234_s11 = sld [smem:[#allocation20_spill]] }
  0x35   : > { %s2505_s18 = scalar_lea.hbm %s3234_s11, 2048 }
  0x36   : > { %p2506_p9 = scmp.ne.s32.totalorder %s3234_s11, %s2505_s18  ;;  %p2512_p12 = scmp.lt.u32.totalorder %s2505_s18, %s3234_s11 }
  0x38   : > { %p2508_p10 = pnand %p2506_p9, %p2816_p7 }
  0x3a   : > { %p2509_p11 = pneg %p2508_p10 }
  0x3c   : > { %p2514_p13 = pnand %p2512_p12, %p2509_p11 }
  0x3e   : > { %2517 = shalt.err (!%p2514_p13)
}
  0x3f   : > { %s2518_s26 = scalar_lea.vmem %s2796_s0, 2048  ;;  %p2526_p6 = scmp.lt.s32.totalorder %s2796_s0, %s2796_s0 }
  0x40   : > { %p2519_p0 = scmp.ne.s32.totalorder %s2796_s0, %s2518_s26  ;;  %p2527_p8 = scmp.lt.s32.totalorder %s2518_s26, %s2518_s26 }
  0x42   : > { %p2521_p1 = pnand %p2519_p0, %p2816_p7  ;;  %p2528_p9 = por %p2527_p8, %p2526_p6 }
  0x44   : > { %p2522_p4 = pneg %p2521_p1 }
  0x46   : > { %p2529_p10 = pnand %p2528_p9, %p2522_p4 }
  0x48   : > { %2532 = shalt.err (!%p2529_p10)
}
  0x49   : > { %s3219_s17 = smov 64   ;;  %s3220_s16 = smov 4  }
  0x4a   : > { %2378 = dma.hbm_to_vmem [thread:$0]  (!%p2800_p5), %s3234_s11, 2048, %s2796_s0, [#allocation8], %s3219_s17, %s3219_s17, %s3220_s16  }
  0x4b   : > { %s3235_s18 = sld [smem:[#allocation18_spill]] }
  0x51   : > { %s2533_s1 = scalar_lea.hbm %s3235_s18, 128 }
  0x52   : > { %p2534_p11 = scmp.ne.s32.totalorder %s3235_s18, %s2533_s1  ;;  %p2540_p0 = scmp.lt.u32.totalorder %s2533_s1, %s3235_s18 }
  0x54   : > { %p2536_p12 = pnand %p2534_p11, %p2816_p7 }
  0x56   : > { %p2537_p13 = pneg %p2536_p12 }
  0x58   : > { %p2542_p1 = pnand %p2540_p0, %p2537_p13 }
  0x5a   : > { %2545 = shalt.err (!%p2542_p1)
}
  0x5b   : > { %s2546_s0 = scalar_lea.vmem %s2804_s19, 128  ;;  %p2554_p9 = scmp.lt.s32.totalorder %s2804_s19, %s2804_s19 }
  0x5c   : > { %p2547_p4 = scmp.ne.s32.totalorder %s2804_s19, %s2546_s0  ;;  %p2555_p10 = scmp.lt.s32.totalorder %s2546_s0, %s2546_s0 }
  0x5e   : > { %p2549_p6 = pnand %p2547_p4, %p2816_p7  ;;  %p2556_p11 = por %p2555_p10, %p2554_p9 }
  0x60   : > { %p2550_p8 = pneg %p2549_p6 }
  0x62   : > { %p2557_p12 = pnand %p2556_p11, %p2550_p8 }
  0x64   : > { %2560 = shalt.err (!%p2557_p12)
}
  0x65   : > { %2369 = dma.hbm_to_vmem [thread:$0]  (!%p2800_p5), %s3235_s18, 128, %s2804_s19, [#allocation3]  }
  0x66   : > { %s2561_s25 = scalar_lea.hbm %s3206_s10, 32 }
  0x67   : > { %p2562_p13 = scmp.ne.s32.totalorder %s3206_s10, %s2561_s25  ;;  %p2568_p4 = scmp.lt.u32.totalorder %s2561_s25, %s3206_s10 }
  0x69   : > { %p2564_p0 = pnand %p2562_p13, %p2816_p7 }
  0x6b   : > { %p2565_p1 = pneg %p2564_p0 }
  0x6d   : > { %p2570_p6 = pnand %p2568_p4, %p2565_p1 }
  0x6f   : > { %2573 = shalt.err (!%p2570_p6)
}
  0x70   : > { %s2574_s0 = scalar_lea.vmem %s480_s20, 32  ;;  %p2582_p11 = scmp.lt.s32.totalorder %s480_s20, %s480_s20 }
  0x71   : > { %p2575_p8 = scmp.ne.s32.totalorder %s480_s20, %s2574_s0  ;;  %p2583_p12 = scmp.lt.s32.totalorder %s2574_s0, %s2574_s0 }
  0x73   : > { %p2577_p9 = pnand %p2575_p8, %p2816_p7  ;;  %p2584_p2 = por %p2583_p12, %p2582_p11 }
  0x75   : > { %p2578_p10 = pneg %p2577_p9 }
  0x77   : > { %p2585_p3 = pnand %p2584_p2, %p2578_p10 }
  0x79   : > { %2588 = shalt.err (!%p2585_p3)
}
  0x7a   : > { %s2675_s19 = smov 16   ;;  %s2676_s2 = smov 1  }
  0x7b   : > { %2375 = dma.hbm_to_vmem [thread:$0]  (!%p2800_p5), %s3206_s10, 32, %s480_s20, [#allocation5], %s2675_s19, %s2675_s19, %s2676_s2  }
  0x7c   : > { %s2677_s23 = smov [#allocation9]   ;;  %s2678_s29 = smov [#allocation10]  }
  0x7d   : > { %s505_s25 = sshll.u32 %s2677_s23, 4  ;;  %s524_s1 = sshll.u32 %s2678_s29, 4  ;;  %s506_s25 = int_to_ptr.vmem [resolvable:$true] %s505_s25  ;;  %s525_s1 = int_to_ptr.vmem [resolvable:$true] %s524_s1 }
  0x7e   : > { %s2589_s0 = scalar_lea.hbm %s3208_s12, 32 }
  0x7f   : > { %p2590_p2 = scmp.ne.s32.totalorder %s3208_s12, %s2589_s0  ;;  %p2596_p0 = scmp.lt.u32.totalorder %s2589_s0, %s3208_s12 }
  0x81   : > { %p2592_p3 = pnand %p2590_p2, %p2816_p7 }
  0x83   : > { %p2593_p13 = pneg %p2592_p3 }
  0x85   : > { %p2598_p1 = pnand %p2596_p0, %p2593_p13 }
  0x87   : > { %2601 = shalt.err (!%p2598_p1)
}
  0x88   : > { %s2602_s20 = scalar_lea.vmem %s506_s25, 32  ;;  %p2610_p9 = scmp.lt.s32.totalorder %s506_s25, %s506_s25 }
  0x89   : > { %p2603_p4 = scmp.ne.s32.totalorder %s506_s25, %s2602_s20  ;;  %p2611_p10 = scmp.lt.s32.totalorder %s2602_s20, %s2602_s20 }
  0x8b   : > { %p2605_p6 = pnand %p2603_p4, %p2816_p7  ;;  %p2612_p11 = por %p2611_p10, %p2610_p9 }
  0x8d   : > { %p2606_p8 = pneg %p2605_p6 }
  0x8f   : > { %p2613_p12 = pnand %p2612_p11, %p2606_p8 }
  0x91   : > { %2616 = shalt.err (!%p2613_p12)
}
  0x92   : > { %2381 = dma.hbm_to_vmem [thread:$0]  (!%p2800_p5), %s3208_s12, 32, %s506_s25, [#allocation8], %s2675_s19, %s2675_s19, %s2676_s2  }
  0x93   : > { %s2617_s14 = scalar_lea.hbm %s3211_s15, 256 }
  0x94   : > { %p2618_p2 = scmp.ne.s32.totalorder %s3211_s15, %s2617_s14  ;;  %p2624_p0 = scmp.lt.u32.totalorder %s2617_s14, %s3211_s15 }
  0x96   : > { %p2620_p3 = pnand %p2618_p2, %p2816_p7 }
  0x98   : > { %p2621_p13 = pneg %p2620_p3 }
  0x9a   : > { %p2626_p1 = pnand %p2624_p0, %p2621_p13 }
  0x9c   : > { %2629 = shalt.err (!%p2626_p1)
}
  0x9d   : > { %s2630_s26 = scalar_lea.vmem %s525_s1, 256  ;;  %p2638_p9 = scmp.lt.s32.totalorder %s525_s1, %s525_s1 }
  0x9e   : > { %p2631_p4 = scmp.ne.s32.totalorder %s525_s1, %s2630_s26  ;;  %p2639_p10 = scmp.lt.s32.totalorder %s2630_s26, %s2630_s26 }
  0xa0   : > { %p2633_p6 = pnand %p2631_p4, %p2816_p7  ;;  %p2640_p11 = por %p2639_p10, %p2638_p9 }
  0xa2   : > { %p2634_p8 = pneg %p2633_p6 }
  0xa4   : > { %p2641_p12 = pnand %p2640_p11, %p2634_p8 }
  0xa6   : > { %2644 = shalt.err (!%p2641_p12)
}
  0xa7   : > { %s3236_s19 = smov 4   ;;  %s3237_s2 = smov 64  }
  0xa8   : > { %2384 = dma.hbm_to_vmem [thread:$0]  (!%p2800_p5), %s3211_s15, 256, %s525_s1, [#allocation11], %s3237_s2, %s3237_s2, %s3236_s19  }
  0xa9   : > { %p3238_p2 = scmp.ne.s32.totalorder %s3230_s28, 0 }
  0xaa   : > { %p3239_p7 = scmp.eq.s32.totalorder (!%p3238_p2), %s2783_s27, 0 }
  0xab   : > { %550 = sbr.rel (%p3238_p2) target bundleno = 5352 (0x14e8), region = 88 }
  0xb2   : > { %2650 = dma.done.wait (%p3239_p7), [#allocation3], 128   ;;  %p3240_p3 = pmov %p3239_p7 }
  0xb4   : > { %2652 = vsyncadd (%p3240_p3), [#allocation3], 4294967168  ;;  %p3241_p13 = pmov %p3240_p3 }
  0xb5   : > { %p3242_p0 = pmov %p3240_p3 }
  0xb6   : > { %2654 = dma.done.wait (%p3241_p13), [#allocation5], 160  }
  0xb7   : > { %2656 = vsyncadd (%p3242_p0), [#allocation5], 4294967136  ;;  %p3243_p1 = pmov %p3242_p0 }
  0xb8   : > { %p3244_p5 = pmov %p3242_p0 }
  0xb9   : > { %2658 = dma.done.wait (%p3243_p1), [#allocation8], 2080  }
  0xba   : > { %2660 = vsyncadd (%p3244_p5), [#allocation8], 4294965216  ;;  %p3245_p4 = pmov %p3242_p0 }
  0xbb   : > { %p3246_p6 = pmov %p3242_p0 }
  0xbc   : > { %2662 = dma.done.wait (%p3245_p4), [#allocation11], 256  }
  0xbd   : > { %2664 = vsyncadd (%p3246_p6), [#allocation11], 4294967040  ;;  %p620_p8 = scmp.lt.s32.totalorder %s2783_s27, 1  ;;  %v2679_v0 = vmov 0.0   ;;  %vm2680_vm0 = vmmov 0   ;;  %s3247_s1 = sld [smem:[#allocation17_spill]] }
  0xbe   : > { %2198 = vmatprep.subr.bf16.mxu1 %v2679_v0  ;;  %2202 = vmatprep.mubr.msk.bf16.mxu1 %vm2680_vm0, %v2679_v0  ;;  %v2423_v1 = vld [vmem:[%s3199_s3] sm:$0xff]   ;;  %v2424_v2 = vld [vmem:[%s3199_s3 + $0x8] sm:$0xff]   ;;  %vm658_vm1 = vcmask 261120   ;;  %s2681_s23 = smov 112   ;;  %s2682_s29 = smov 96   ;;  %vm706_vm2 = vcmask 130048  }
  0xbf   : > { %s3253_s27 = smov (!%p620_p8, %s2783_s27), 1  ;;  %2212 = vmatprep.subr.bf16.mxu0 %v2679_v0  ;;  %2214 = vmatprep.mubr.msk.bf16.mxu0 %vm2680_vm0, %v2679_v0  ;;  %v631_v4 = vld [vmem:[#allocation2] sm:$0xff]  ;;  %s2683_s21 = smov 80   ;;  %v3009_v20 = vld [vmem:[#allocation4] sm:$0xff]  ;;  %vm753_vm3 = vcmask 64512   ;;  %vm771_vm4 = vcmask 1043456  }
  0xc0   : > { %s2059_s24 = sshll.u32 %s3253_s27, 3  ;;  %2199 = vmatpush3.bf16.msra.mxu1 %v2423_v1  ;;  %v2061_v8 = vld [vmem:[%s3200_s4] ss:$0 sm:$0xff]  ;;  %s2684_s26 = smov 64   ;;  %v2426_v56 = vld [vmem:[%s3201_s5 + $0x8] sm:$0xff]  }
  0xc1   : > { %2200 = vmatprep.subr.bf16.mxu1 %v2679_v0  ;;  %s2685_s19 = smov 48   ;;  %v2425_v55 = vld [vmem:[%s3201_s5] sm:$0xff]   ;;  %s2686_s30 = smov 16  }
  0xc2   : > { %s3248_s14 = sld [smem:[#allocation21_spill]] }
  0xc3   : > { %s623_s20 = scalar_lea.vmem %s3247_s1, %s2059_s24 }
  0xc4   : > { %v629_v3 = vld [vmem:[%s623_s20] sm:$0xff]  ;;  %2201 = vmatpush3.bf16.msra.mxu1 %v2424_v2 }
  0xc5   : > { %v630_v5 = vmul.f32 5.656854, %v629_v3  ;;  %2206 = vmatprep.subr.bf16.mxu1 %v2679_v0 }
  0xc7   : > { %v2985_v6 = vadd.f32 %v631_v4, %v630_v5  ;;  %v2069_v5 = vld [vmem:[%s3202_s6] ss:$0 sm:$0xff] }
  0xc9   : > { %v634_v7 = vpack.c.bf16 %v2985_v6, %v2985_v6 }
  0xcb   : > { %2203 = vmatmul.mubr.msk.bf16.vlgmr.msra.gmra.mrb[0].mxu1 %vm658_vm1, %v634_v7 }
  0xcc   : > { %2208 = vmatprep.mubr.msk.bf16.mxu1 %vm2680_vm0, %v2679_v0 }
 0x19e   : > { %v696_v9 = vpop.f32.mrb[0].mxu1 }
 0x19f   : > { %v697_v10 = vadd.f32 %v2061_v8, %v696_v9  ;;  %v2204_v11 = vpop.f32.mrb[1].mxu1 }
 0x1a0   : > { %v699_v12 = vpop.f32.mrb[2].mxu1 }
 0x1a1   : > { %v702_v13 = vpack.c.bf16 %v697_v10, %v697_v10  ;;  %v2205_v14 = vpop.f32.mrb[3].mxu1 }
 0x1a3   : > { %815 = vrot.lane.b32.xlu1 %v702_v13, %s2681_s23  ;;  %704 = vrot.lane.b32.xlu0 %v702_v13, %s2682_s29 }
 0x1a7   : > { %817 = vrot.lane.b32.xlu0 %v702_v13, %s2683_s21 }
 0x215   : > { %v705_v15 = vpop.permute.xlu0 %704  ;;  %v816_v19 = vpop.permute.xlu1 %815 }
 0x216   : > { %v711_v16 = vsel %vm706_vm2, %v705_v15, 0 }
 0x217   : > { %2207 = vmatpush3.bf16.xpose.msra.mxu1 %v711_v16  ;;  %v2427_v16 = vld [vmem:[%s3205_s9] sm:$0xff]  }
 0x218   : > { %2218 = vmatprep.subr.bf16.mxu1 %v2679_v0 }
 0x219   : > { %v818_v17 = vpop.permute.xlu0 %817 }
 0x21a   : > { %v823_v18 = vsel %vm706_vm2, %v818_v17, 0  ;;  %v2428_v17 = vld [vmem:[%s3205_s9 + $0x8] sm:$0xff]  }
 0x21e   : > { %2209 = vmatmul.mubr.msk.bf16.vlgmr.msra.gmra.mrb[4].mxu1 %vm706_vm2, %v702_v13 }
 0x21f   : > { %2219 = vmatpush3.bf16.xpose.msra.mxu1 %v823_v18  ;;  %2220 = vmatprep.mubr.msk.bf16.mxu1 %vm2680_vm0, %v2679_v0  ;;  %v2430_v18 = vld [vmem:[#allocation7 + $0x8] sm:$0xff]  }
 0x220   : > { %2230 = vmatprep.subr.bf16.mxu1 %v2679_v0 }
 0x226   : > { %2221 = vmatmul.mubr.msk.bf16.vlgmr.msra.gmra.mrb[8].mxu1 %vm706_vm2, %v816_v19  ;;  %v2431_v19 = vld [vmem:[#allocation7 + $0x10] sm:$0xff]  }
 0x227   : > { %2234 = vmatprep.mubr.msk.bf16.mxu1 %vm2680_vm0, %v2679_v0  ;;  %2231 = vmatpush3.bf16.msra.mxu1 %v2425_v55 }
 0x228   : > { %2232 = vmatprep.subr.bf16.mxu1 %v2679_v0 }
 0x22b   : > { %2233 = vmatpush3.bf16.msra.mxu1 %v2426_v56 }
 0x22c   : > { %2246 = vmatprep.subr.bf16.mxu1 %v2679_v0 }
 0x2f1   : > { %v747_v21 = vpop.f32.mrb[4].mxu1 }
 0x2f2   : > { %v748_v22 = vadd.f32 %v747_v21, %v3009_v20  ;;  %v2210_v23 = vpop.f32.mrb[5].mxu1  ;;  %v2432_v21 = vld [vmem:[#allocation7 + $0x18] sm:$0xff]  }
 0x2f3   : > { %v750_v24 = vpop.f32.mrb[6].mxu1  ;;  %v2434_v23 = vld [vmem:[#allocation7 + $0x28] sm:$0xff]  }
 0x2f4   : > { %v2211_v25 = vpop.f32.mrb[7].mxu1  ;;  %v754_v26 = vsel %vm753_vm3, %v748_v22, -inf }
 0x2f5   : > { %755 = vmax.xlane.f32.xlu1 %v754_v26 }
 0x2f9   : > { %v859_v27 = vpop.f32.mrb[8].mxu1 }
 0x2fa   : > { %v860_v28 = vadd.f32 %v859_v27, %v3009_v20  ;;  %v2222_v29 = vpop.f32.mrb[9].mxu1 }
 0x2fb   : > { %v862_v30 = vpop.f32.mrb[10].mxu1 }
 0x2fc   : > { %v2223_v31 = vpop.f32.mrb[11].mxu1  ;;  %v865_v32 = vsel %vm753_vm3, %v860_v28, -inf }
 0x2fd   : > { %866 = vmax.xlane.f32.xlu0 %v865_v32 }
 0x382   : > { %v756_v33 = vpop.xlane.xlu1 %755 }
 0x383   : > { %v757_v34 = vsub.f32 %v748_v22, %v756_v33  ;;  %v2433_v22 = vld [vmem:[#allocation7 + $0x20] sm:$0xff]  }
 0x385   : > { %v758_v35 = vmul.f32 1.442695, %v757_v34  ;;  %v2073_v34 = vld [vmem:[%s3203_s7] ss:$0 sm:$0xff] }
 0x387   : > { %2453 = vpow2.f32 %v758_v35 }
 0x38a   : > { %v867_v36 = vpop.xlane.xlu0 %866 }
 0x38b   : > { %v868_v37 = vsub.f32 %v860_v28, %v867_v36  ;;  %v2074_v36 = vld [vmem:[%s3204_s8] ss:$0 sm:$0xff] }
 0x38d   : > { %v869_v38 = vmul.f32 1.442695, %v868_v37 }
 0x38f   : > { %2455 = vpow2.f32 %v869_v38 }
 0x391   : > { %v2454_v39 = vpop.eup %2453 }
 0x392   : > { %v760_v40 = vsel %vm753_vm3, %v2454_v39, 0.0 }
 0x393   : > { %761 = vadd.xlane.f32.xlu0 %v760_v40  ;;  %v2435_v40 = vld [vmem:[#allocation7 + $0x30] sm:$0xff]  }
 0x399   : > { %v2456_v41 = vpop.eup %2455 }
 0x39a   : > { %v871_v42 = vsel %vm753_vm3, %v2456_v41, 0.0 }
 0x39b   : > { %872 = vadd.xlane.f32.xlu1 %v871_v42  ;;  %v2075_v42 = vld [vmem:[#allocation6] ss:$0 sm:$0xff] }
 0x3a9   : > { %766 = vrot.lane.b32.xlu0 %v702_v13, %s2684_s26 }
 0x3ac   : > { %877 = vrot.lane.b32.xlu1 %v702_v13, %s2685_s19 }
 0x420   : > { %v762_v43 = vpop.xlane.xlu0 %761 }
 0x421   : > { %2457 = vrcp.f32 %v762_v43 }
 0x424   : > { %v767_v44 = vpop.permute.xlu0 %766 }
 0x425   : > { %v773_v45 = vsel %vm771_vm4, %v767_v44, 0 }
 0x426   : > { %2213 = vmatpush3.bf16.msra.mxu0 %v773_v45 }
 0x427   : > { %2224 = vmatprep.subr.bf16.mxu0 %v2679_v0 }
 0x428   : > { %v873_v46 = vpop.xlane.xlu1 %872 }
 0x429   : > { %2459 = vrcp.f32 %v873_v46 }
 0x42b   : > { %v2458_v47 = vpop.eup %2457 }
 0x42c   : > { %v764_v48 = vmul.f32 %v2458_v47, %v2454_v39  ;;  %v878_v49 = vpop.permute.xlu1 %877 }
 0x42d   : > { %v883_v51 = vsel %vm771_vm4, %v878_v49, 0 }
 0x42e   : > { %v765_v50 = vpack.c.bf16 %v764_v48, %v764_v48 }
 0x430   : > { %2215 = vmatmul.mubr.msk.bf16.vlgmr.msra.gmra.mrb[0].mxu0 %vm753_vm3, %v765_v50  ;;  %v2079_v50 = vld [vmem:[#allocation9] ss:$0 sm:$0xff] }
 0x431   : > { %2225 = vmatpush3.bf16.msra.mxu0 %v883_v51  ;;  %2226 = vmatprep.mubr.msk.bf16.mxu0 %vm2680_vm0, %v2679_v0 }
 0x432   : > { %2238 = vmatprep.subr.bf16.mxu0 %v2679_v0 }
 0x433   : > { %v2460_v52 = vpop.eup %2459 }
 0x434   : > { %v875_v53 = vmul.f32 %v2460_v52, %v2456_v41  ;;  %v2436_v41 = vld [vmem:[#allocation7 + $0x38] sm:$0xff]  }
 0x436   : > { %v876_v54 = vpack.c.bf16 %v875_v53, %v875_v53 }
 0x438   : > { %2227 = vmatmul.mubr.msk.bf16.vlgmr.msra.gmra.mrb[4].mxu0 %vm753_vm3, %v876_v54 }
 0x439   : > { %2242 = vmatprep.mubr.msk.bf16.mxu0 %vm2680_vm0, %v2679_v0  ;;  %2239 = vmatpush3.bf16.msra.mxu0 %v2427_v16  ;;  %v2095_v16 = vld [vmem:[%s3200_s4 + $0x1] ss:$0 sm:$0xff] }
 0x43a   : > { %2240 = vmatprep.subr.bf16.mxu0 %v2679_v0 }
 0x43d   : > { %2241 = vmatpush3.bf16.msra.mxu0 %v2428_v17 }
 0x43e   : > { %2266 = vmatprep.subr.bf16.mxu0 %v2679_v0 }
 0x503   : > { %v809_v57 = vpop.f32.mrb[0].mxu0 }
 0x504   : > { %v2216_v58 = vpop.f32.mrb[1].mxu0 }
 0x505   : > { %v812_v59 = vpop.f32.mrb[2].mxu0 }
 0x506   : > { %v2217_v60 = vpop.f32.mrb[3].mxu0 }
 0x507   : > { %v2437_v60 = vld [vmem:[%s3199_s3 + $0x10] sm:$0xff]  }
 0x50b   : > { %v919_v61 = vpop.f32.mrb[4].mxu0 }
 0x50c   : > { %926 = vrot.lane.b32.xlu1 %v919_v61, %s2686_s30  ;;  %v2228_v62 = vpop.f32.mrb[5].mxu0  ;;  %v2438_v61 = vld [vmem:[%s3199_s3 + $0x18] sm:$0xff]  }
 0x50d   : > { %v922_v63 = vpop.f32.mrb[6].mxu0 }
 0x50e   : > { %v2229_v1 = vpop.f32.mrb[7].mxu0 }
 0x57e   : > { %v927_v2 = vpop.permute.xlu1 %926 }
 0x57f   : > { %v929_v3 = vsel %vm706_vm2, %v809_v57, %v927_v2 }
 0x580   : > { %v930_v4 = vpack.c.bf16 %v929_v3, %v929_v3 }
 0x582   : > { %2235 = vmatmul.mubr.msk.bf16.vlgmr.msra.gmra.mrb[12].mxu1 %vm658_vm1, %v930_v4 }
 0x583   : > { %2262 = vmatprep.mubr.msk.bf16.mxu1 %vm2680_vm0, %v2679_v0 }
 0x655   : > { %v991_v7 = vpop.f32.mrb[12].mxu1 }
 0x656   : > { %v992_v8 = vadd.f32 %v2069_v5, %v991_v7  ;;  %v2236_v9 = vpop.f32.mrb[13].mxu1 }
 0x657   : > { %v994_v10 = vpop.f32.mrb[14].mxu1 }
 0x658   : > { %v997_v11 = vadd.f32 %v992_v8, %v2985_v6  ;;  %v2237_v12 = vpop.f32.mrb[15].mxu1  ;;  %v2429_v6 = vld [vmem:[#allocation7] sm:$0xff]   ;;  %v2088_v10 = vld [vmem:[%s3209_s13] ss:$0 sm:$0xff] }
 0x659   : > { %2247 = vmatpush3.bf16.msra.mxu1 %v2429_v6  ;;  %v2089_v12 = vld [vmem:[%s3248_s14] ss:$0 sm:$0xff] }
 0x65a   : > { %v1000_v13 = vsel %vm658_vm1, %v997_v11, 0.0  ;;  %v1005_v14 = vmul.f32 %v997_v11, %v997_v11  ;;  %2248 = vmatprep.subr.bf16.mxu1 %v2679_v0 }
 0x65b   : > { %1001 = vadd.xlane.f32.xlu0 %v1000_v13 }
 0x65c   : > { %v1006_v15 = vsel %vm658_vm1, %v1005_v14, 0.0 }
 0x65d   : > { %1007 = vadd.xlane.f32.xlu1 %v1006_v15  ;;  %2249 = vmatpush3.bf16.msra.mxu1 %v2430_v18 }
 0x65e   : > { %2250 = vmatprep.subr.bf16.mxu1 %v2679_v0 }
 0x661   : > { %2251 = vmatpush3.bf16.msra.mxu1 %v2431_v19 }
 0x662   : > { %2252 = vmatprep.subr.bf16.mxu1 %v2679_v0 }
 0x665   : > { %2253 = vmatpush3.bf16.msra.mxu1 %v2432_v21 }
 0x666   : > { %2254 = vmatprep.subr.bf16.mxu1 %v2679_v0 }
 0x669   : > { %2255 = vmatpush3.bf16.msra.mxu1 %v2433_v22 }
 0x66a   : > { %2256 = vmatprep.subr.bf16.mxu1 %v2679_v0 }
 0x66d   : > { %2257 = vmatpush3.bf16.msra.mxu1 %v2434_v23 }
 0x66e   : > { %2258 = vmatprep.subr.bf16.mxu1 %v2679_v0 }
 0x671   : > { %2259 = vmatpush3.bf16.msra.mxu1 %v2435_v40 }
 0x672   : > { %2260 = vmatprep.subr.bf16.mxu1 %v2679_v0 }
 0x675   : > { %2261 = vmatpush3.bf16.msra.mxu1 %v2436_v41 }
 0x676   : > { %2292 = vmatprep.subr.bf16.mxu1 %v2679_v0 }
 0x6e8   : > { %v1002_v24 = vpop.xlane.xlu0 %1001 }
 0x6e9   : > { %v1004_v25 = vmul.f32 0.03125, %v1002_v24 }
 0x6ea   : > { %v1008_v26 = vpop.xlane.xlu1 %1007 }
 0x6eb   : > { %v1010_v27 = vmul.f32 %v1004_v25, %v1004_v25  ;;  %v1009_v28 = vmul.f32 0.03125, %v1008_v26  ;;  %v1013_v32 = vsub.f32 %v997_v11, %v1004_v25 }
 0x6ed   : > { %v1011_v29 = vsub.f32 %v1009_v28, %v1010_v27 }
 0x6ef   : > { %v1012_v30 = vmax.f32 %v1011_v29, 0.0 }
 0x6f1   : > { %v1014_v31 = vadd.f32 1e-05, %v1012_v30 }
 0x6f3   : > { %2461 = vrsqrt.f32 %v1014_v31 }
 0x6fd   : > { %v2462_v33 = vpop.eup %2461 }
 0x6fe   : > { %v1016_v35 = vmul.f32 %v2462_v33, %v1013_v32 }
 0x700   : > { %v1023_v37 = vmul.f32 %v2073_v34, %v1016_v35 }
 0x702   : > { %v1030_v38 = vadd.f32 %v2074_v36, %v1023_v37 }
 0x704   : > { %v1031_v39 = vpack.c.bf16 %v1030_v38, %v1030_v38 }
 0x706   : > { %2243 = vmatmul.mubr.msk.bf16.vlgmr.msra.gmra.mrb[8].mxu0 %vm658_vm1, %v1031_v39 }
 0x707   : > { %2270 = vmatprep.mubr.msk.bf16.mxu0 %vm2680_vm0, %v2679_v0  ;;  %2267 = vmatpush3.bf16.msra.mxu0 %v2437_v60 }
 0x708   : > { %2268 = vmatprep.subr.bf16.mxu0 %v2679_v0 }
 0x70b   : > { %2269 = vmatpush3.bf16.msra.mxu0 %v2438_v61 }
 0x70c   : > { %2274 = vmatprep.subr.bf16.mxu0 %v2679_v0 }
 0x7d9   : > { %v1092_v43 = vpop.f32.mrb[8].mxu0 }
 0x7da   : > { %v1093_v44 = vadd.f32 %v2075_v42, %v1092_v43  ;;  %v2244_v45 = vpop.f32.mrb[9].mxu0 }
 0x7db   : > { %v1095_v46 = vpop.f32.mrb[10].mxu0 }
 0x7dc   : > { %v1098_v47 = vmax.f32 %v1093_v44, 0.0  ;;  %v2245_v48 = vpop.f32.mrb[11].mxu0 }
 0x7de   : > { %v1099_v49 = vpack.c.bf16 %v1098_v47, %v1098_v47 }
 0x7e0   : > { %2263 = vmatmul.mubr.bf16.vlgmr.msra.gmra.mrb[16].mxu1 %v1099_v49 }
 0x7e1   : > { %2294 = vmatprep.mubr.msk.bf16.mxu1 %vm2680_vm0, %v2679_v0 }
 0x8b3   : > { %v1205_v51 = vpop.f32.mrb[16].mxu1 }
 0x8b4   : > { %v1206_v52 = vadd.f32 %v2079_v50, %v1205_v51  ;;  %v2264_v53 = vpop.f32.mrb[17].mxu1 }
 0x8b5   : > { %v1208_v54 = vpop.f32.mrb[18].mxu1 }
 0x8b6   : > { %v1211_v55 = vadd.f32 %v1206_v52, %v1030_v38  ;;  %v2265_v56 = vpop.f32.mrb[19].mxu1 }
 0x8b8   : > { %v1214_v57 = vsel %vm658_vm1, %v1211_v55, 0.0  ;;  %v1218_v58 = vmul.f32 %v1211_v55, %v1211_v55 }
 0x8b9   : > { %1215 = vadd.xlane.f32.xlu0 %v1214_v57 }
 0x8ba   : > { %v1219_v59 = vsel %vm658_vm1, %v1218_v58, 0.0 }
 0x8bd   : > { %1220 = vadd.xlane.f32.xlu0 %v1219_v59 }
 0x946   : > { %v1216_v62 = vpop.xlane.xlu0 %1215 }
 0x947   : > { %v1217_v63 = vmul.f32 0.03125, %v1216_v62 }
 0x949   : > { %v1223_v2 = vmul.f32 %v1217_v63, %v1217_v63  ;;  %v1226_v8 = vsub.f32 %v1211_v55, %v1217_v63 }
 0x94a   : > { %v1221_v1 = vpop.xlane.xlu0 %1220 }
 0x94b   : > { %v1222_v3 = vmul.f32 0.03125, %v1221_v1 }
 0x94d   : > { %v1224_v4 = vsub.f32 %v1222_v3, %v1223_v2  ;;  %v2439_v2 = vld [vmem:[%s3201_s5 + $0x10] sm:$0xff]   ;;  %v2440_v3 = vld [vmem:[%s3201_s5 + $0x18] sm:$0xff]  }
 0x94f   : > { %v1225_v5 = vmax.f32 %v1224_v4, 0.0 }
 0x951   : > { %v1227_v7 = vadd.f32 1e-05, %v1225_v5 }
 0x953   : > { %2463 = vrsqrt.f32 %v1227_v7 }
 0x95d   : > { %v2464_v9 = vpop.eup %2463 }
 0x95e   : > { %v1229_v11 = vmul.f32 %v2464_v9, %v1226_v8 }
 0x960   : > { %v1236_v13 = vmul.f32 %v2088_v10, %v1229_v11 }
 0x962   : > { %v3091_v14 = vadd.f32 %v2089_v12, %v1236_v13  ;;  %v2108_v12 = vld [vmem:[%s3202_s6 + $0x1] ss:$0 sm:$0xff] }
 0x964   : > { %v1244_v15 = vpack.c.bf16 %v3091_v14, %v3091_v14 }
 0x966   : > { %2271 = vmatmul.mubr.msk.bf16.vlgmr.msra.gmra.mrb[12].mxu0 %vm658_vm1, %v1244_v15 }
 0x967   : > { %2276 = vmatprep.mubr.msk.bf16.mxu0 %vm2680_vm0, %v2679_v0 }
 0xa39   : > { %v1307_v17 = vpop.f32.mrb[12].mxu0 }
 0xa3a   : > { %v1308_v6 = vadd.f32 %v2095_v16, %v1307_v17  ;;  %v2272_v18 = vpop.f32.mrb[13].mxu0 }
 0xa3b   : > { %v1310_v19 = vpop.f32.mrb[14].mxu0 }
 0xa3c   : > { %v1313_v21 = vpack.c.bf16 %v1308_v6, %v1308_v6  ;;  %v2273_v22 = vpop.f32.mrb[15].mxu0 }
 0xa3e   : > { %1315 = vrot.lane.b32.xlu1 %v1313_v21, %s2682_s29 }
 0xa42   : > { %1425 = vrot.lane.b32.xlu1 %v1313_v21, %s2683_s21 }
 0xa46   : > { %1423 = vrot.lane.b32.xlu1 %v1313_v21, %s2681_s23 }
 0xab0   : > { %v1316_v23 = vpop.permute.xlu1 %1315 }
 0xab1   : > { %v1321_v24 = vsel %vm706_vm2, %v1316_v23, 0  ;;  %v2441_v23 = vld [vmem:[%s3205_s9 + $0x10] sm:$0xff]  }
 0xab2   : > { %2275 = vmatpush3.bf16.xpose.msra.mxu0 %v1321_v24  ;;  %v2442_v24 = vld [vmem:[%s3205_s9 + $0x18] sm:$0xff]  }
 0xab3   : > { %2280 = vmatprep.subr.bf16.mxu0 %v2679_v0 }
 0xab4   : > { %v1426_v41 = vpop.permute.xlu1 %1425 }
 0xab5   : > { %v1431_v43 = vsel %vm706_vm2, %v1426_v41, 0 }
 0xab8   : > { %v1424_v44 = vpop.permute.xlu1 %1423 }
 0xab9   : > { %2277 = vmatmul.mubr.msk.bf16.vlgmr.msra.gmra.mrb[16].mxu0 %vm706_vm2, %v1313_v21 }
 0xaba   : > { %2282 = vmatprep.mubr.msk.bf16.mxu0 %vm2680_vm0, %v2679_v0 }
 0xb8c   : > { %v1357_v25 = vpop.f32.mrb[16].mxu0 }
 0xb8d   : > { %v1358_v26 = vadd.f32 %v1357_v25, %v3009_v20  ;;  %v2278_v27 = vpop.f32.mrb[17].mxu0  ;;  %v2444_v25 = vld [vmem:[#allocation7 + $0x48] sm:$0xff]  }
 0xb8e   : > { %v1360_v28 = vpop.f32.mrb[18].mxu0  ;;  %v2446_v27 = vld [vmem:[#allocation7 + $0x58] sm:$0xff]  }
 0xb8f   : > { %v2279_v29 = vpop.f32.mrb[19].mxu0  ;;  %v1363_v30 = vsel %vm753_vm3, %v1358_v26, -inf  ;;  %v2447_v28 = vld [vmem:[#allocation7 + $0x60] sm:$0xff]  }
 0xb90   : > { %1364 = vmax.xlane.f32.xlu0 %v1363_v30  ;;  %v2448_v29 = vld [vmem:[#allocation7 + $0x68] sm:$0xff]  }
 0xc1d   : > { %v1365_v31 = vpop.xlane.xlu0 %1364 }
 0xc1e   : > { %v1366_v32 = vsub.f32 %v1358_v26, %v1365_v31  ;;  %v2445_v26 = vld [vmem:[#allocation7 + $0x50] sm:$0xff]  }
 0xc20   : > { %v1367_v33 = vmul.f32 1.442695, %v1366_v32 }
 0xc22   : > { %2465 = vpow2.f32 %v1367_v33 }
 0xc2c   : > { %v2466_v34 = vpop.eup %2465 }
 0xc2d   : > { %v1369_v35 = vsel %vm753_vm3, %v2466_v34, 0.0 }
 0xc2e   : > { %1370 = vadd.xlane.f32.xlu0 %v1369_v35 }
 0xc44   : > { %1375 = vrot.lane.b32.xlu0 %v1313_v21, %s2684_s26  ;;  %s3249_s26 = sld [smem:[#allocation22_spill]] }
 0xcbb   : > { %v1371_v36 = vpop.xlane.xlu0 %1370 }
 0xcbc   : > { %2467 = vrcp.f32 %v1371_v36 }
 0xcbf   : > { %v1376_v37 = vpop.permute.xlu0 %1375 }
 0xcc0   : > { %v1381_v38 = vsel %vm771_vm4, %v1376_v37, 0 }
 0xcc1   : > { %2281 = vmatpush3.bf16.msra.mxu0 %v1381_v38 }
 0xcc2   : > { %2286 = vmatprep.subr.bf16.mxu0 %v2679_v0 }
 0xcc6   : > { %v2468_v39 = vpop.eup %2467 }
 0xcc7   : > { %v1373_v40 = vmul.f32 %v2468_v39, %v2466_v34 }
 0xcc9   : > { %v1374_v42 = vpack.c.bf16 %v1373_v40, %v1373_v40  ;;  %v2114_v40 = vld [vmem:[%s3203_s7 + $0x1] ss:$0 sm:$0xff] }
 0xccb   : > { %2283 = vmatmul.mubr.msk.bf16.vlgmr.msra.gmra.mrb[20].mxu0 %vm753_vm3, %v1374_v42  ;;  %v2115_v42 = vld [vmem:[%s3204_s8 + $0x1] ss:$0 sm:$0xff] }
 0xccc   : > { %2287 = vmatpush3.bf16.xpose.msra.mxu0 %v1431_v43  ;;  %2288 = vmatprep.mubr.msk.bf16.mxu0 %vm2680_vm0, %v2679_v0 }
 0xccd   : > { %2298 = vmatprep.subr.bf16.mxu0 %v2679_v0 }
 0xcd3   : > { %2289 = vmatmul.mubr.msk.bf16.vlgmr.msra.gmra.mrb[24].mxu0 %vm706_vm2, %v1424_v44 }
 0xcd4   : > { %2302 = vmatprep.mubr.msk.bf16.mxu0 %vm2680_vm0, %v2679_v0  ;;  %2299 = vmatpush3.bf16.msra.mxu0 %v2439_v2  ;;  %v2451_v2 = vld [vmem:[#allocation10] sm:$0xff]  }
 0xcd5   : > { %2300 = vmatprep.subr.bf16.mxu0 %v2679_v0 }
 0xcd8   : > { %2301 = vmatpush3.bf16.msra.mxu0 %v2440_v3  ;;  %v2452_v3 = vld [vmem:[#allocation10 + $0x8] sm:$0xff]  }
 0xcd9   : > { %2314 = vmatprep.subr.bf16.mxu0 %v2679_v0 }
 0xd9e   : > { %v1417_v45 = vpop.f32.mrb[20].mxu0 }
 0xd9f   : > { %v2284_v46 = vpop.f32.mrb[21].mxu0 }
 0xda0   : > { %v1420_v47 = vpop.f32.mrb[22].mxu0  ;;  %v2449_v46 = vld [vmem:[#allocation7 + $0x70] sm:$0xff]  }
 0xda1   : > { %v2285_v48 = vpop.f32.mrb[23].mxu0  ;;  %v2450_v47 = vld [vmem:[#allocation7 + $0x78] sm:$0xff]  }
 0xda2   : > { %v2120_v48 = vld [vmem:[#allocation6 + $0x1] ss:$0 sm:$0xff] }
 0xda6   : > { %v1467_v49 = vpop.f32.mrb[24].mxu0 }
 0xda7   : > { %v1468_v50 = vadd.f32 %v1467_v49, %v3009_v20  ;;  %v2290_v51 = vpop.f32.mrb[25].mxu0 }
 0xda8   : > { %v1470_v52 = vpop.f32.mrb[26].mxu0 }
 0xda9   : > { %v2291_v53 = vpop.f32.mrb[27].mxu0  ;;  %v1473_v54 = vsel %vm753_vm3, %v1468_v50, -inf }
 0xdaa   : > { %1474 = vmax.xlane.f32.xlu1 %v1473_v54 }
 0xdbb   : > { %1485 = vrot.lane.b32.xlu1 %v1313_v21, %s2685_s19 }
 0xe37   : > { %v1475_v55 = vpop.xlane.xlu1 %1474 }
 0xe38   : > { %v1476_v56 = vsub.f32 %v1468_v50, %v1475_v55 }
 0xe3a   : > { %v1477_v57 = vmul.f32 1.442695, %v1476_v56  ;;  %v2124_v56 = vld [vmem:[#allocation9 + $0x1] ss:$0 sm:$0xff] }
 0xe3b   : > { %v1486_v58 = vpop.permute.xlu1 %1485 }
 0xe3c   : > { %2469 = vpow2.f32 %v1477_v57  ;;  %v1491_v59 = vsel %vm771_vm4, %v1486_v58, 0 }
 0xe3d   : > { %2293 = vmatpush3.bf16.msra.mxu1 %v1491_v59 }
 0xe3e   : > { %2306 = vmatprep.subr.bf16.mxu1 %v2679_v0 }
 0xe46   : > { %v2470_v60 = vpop.eup %2469 }
 0xe47   : > { %v1479_v20 = vsel %vm753_vm3, %v2470_v60, 0.0 }
 0xe48   : > { %1480 = vadd.xlane.f32.xlu0 %v1479_v20 }
 0xed5   : > { %v1481_v61 = vpop.xlane.xlu0 %1480 }
 0xed6   : > { %2471 = vrcp.f32 %v1481_v61 }
 0xee0   : > { %v2472_v62 = vpop.eup %2471 }
 0xee1   : > { %v1483_v63 = vmul.f32 %v2472_v62, %v2470_v60 }
 0xee3   : > { %v1484_v1 = vpack.c.bf16 %v1483_v63, %v1483_v63 }
 0xee5   : > { %2295 = vmatmul.mubr.msk.bf16.vlgmr.msra.gmra.mrb[20].mxu1 %vm753_vm3, %v1484_v1 }
 0xee6   : > { %2310 = vmatprep.mubr.msk.bf16.mxu1 %vm2680_vm0, %v2679_v0  ;;  %2307 = vmatpush3.bf16.msra.mxu1 %v2441_v23 }
 0xee7   : > { %2308 = vmatprep.subr.bf16.mxu1 %v2679_v0 }
 0xeea   : > { %2309 = vmatpush3.bf16.msra.mxu1 %v2442_v24 }
 0xeeb   : > { %2334 = vmatprep.subr.bf16.mxu1 %v2679_v0 }
 0xfb8   : > { %v1527_v4 = vpop.f32.mrb[20].mxu1 }
 0xfb9   : > { %1534 = vrot.lane.b32.xlu0 %v1527_v4, %s2686_s30  ;;  %v2296_v5 = vpop.f32.mrb[21].mxu1  ;;  %s3250_s30 = sld [smem:[#allocation23_spill]] }
 0xfba   : > { %v1530_v7 = vpop.f32.mrb[22].mxu1 }
 0xfbb   : > { %v2297_v8 = vpop.f32.mrb[23].mxu1 }
 0xfbf   : > { %s627_s0 = scalar_lea.vmem %s3250_s30, %s2059_s24 }
0x102b   : > { %v1535_v9 = vpop.permute.xlu0 %1534 }
0x102c   : > { %v1537_v10 = vsel %vm706_vm2, %v1417_v45, %v1535_v9 }
0x102d   : > { %v1538_v11 = vpack.c.bf16 %v1537_v10, %v1537_v10 }
0x102f   : > { %2303 = vmatmul.mubr.msk.bf16.vlgmr.msra.gmra.mrb[28].mxu0 %vm658_vm1, %v1538_v11 }
0x1030   : > { %2330 = vmatprep.mubr.msk.bf16.mxu0 %vm2680_vm0, %v2679_v0 }
0x1102   : > { %v1601_v13 = vpop.f32.mrb[28].mxu0 }
0x1103   : > { %v1602_v15 = vadd.f32 %v2108_v12, %v1601_v13  ;;  %v2304_v16 = vpop.f32.mrb[29].mxu0 }
0x1104   : > { %v1604_v17 = vpop.f32.mrb[30].mxu0  ;;  %v2135_v16 = vld [vmem:[%s3209_s13 + $0x1] ss:$0 sm:$0xff] }
0x1105   : > { %v1607_v6 = vadd.f32 %v1602_v15, %v3091_v14  ;;  %v2305_v18 = vpop.f32.mrb[31].mxu0  ;;  %v2443_v14 = vld [vmem:[#allocation7 + $0x40] sm:$0xff]  }
0x1106   : > { %2315 = vmatpush3.bf16.msra.mxu0 %v2443_v14 }
0x1107   : > { %v1612_v19 = vsel %vm658_vm1, %v1607_v6, 0.0  ;;  %v1616_v21 = vmul.f32 %v1607_v6, %v1607_v6  ;;  %2316 = vmatprep.subr.bf16.mxu0 %v2679_v0 }
0x1108   : > { %1613 = vadd.xlane.f32.xlu1 %v1612_v19 }
0x1109   : > { %v1617_v22 = vsel %vm658_vm1, %v1616_v21, 0.0  ;;  %v2137_v21 = vld [vmem:[%s3249_s26] ss:$0 sm:$0xff] }
0x110a   : > { %1618 = vadd.xlane.f32.xlu0 %v1617_v22  ;;  %2317 = vmatpush3.bf16.msra.mxu0 %v2444_v25 }
0x110b   : > { %2318 = vmatprep.subr.bf16.mxu0 %v2679_v0 }
0x110e   : > { %2319 = vmatpush3.bf16.msra.mxu0 %v2445_v26 }
0x110f   : > { %2320 = vmatprep.subr.bf16.mxu0 %v2679_v0 }
0x1112   : > { %2321 = vmatpush3.bf16.msra.mxu0 %v2446_v27 }
0x1113   : > { %2322 = vmatprep.subr.bf16.mxu0 %v2679_v0 }
0x1116   : > { %2323 = vmatpush3.bf16.msra.mxu0 %v2447_v28 }
0x1117   : > { %2324 = vmatprep.subr.bf16.mxu0 %v2679_v0 }
0x111a   : > { %2325 = vmatpush3.bf16.msra.mxu0 %v2448_v29 }
0x111b   : > { %2326 = vmatprep.subr.bf16.mxu0 %v2679_v0 }
0x111e   : > { %2327 = vmatpush3.bf16.msra.mxu0 %v2449_v46 }
0x111f   : > { %2328 = vmatprep.subr.bf16.mxu0 %v2679_v0 }
0x1122   : > { %2329 = vmatpush3.bf16.msra.mxu0 %v2450_v47 }
0x1195   : > { %v1614_v30 = vpop.xlane.xlu1 %1613 }
0x1196   : > { %v1615_v31 = vmul.f32 0.03125, %v1614_v30 }
0x1197   : > { %v1619_v32 = vpop.xlane.xlu0 %1618 }
0x1198   : > { %v1621_v33 = vmul.f32 %v1615_v31, %v1615_v31  ;;  %v1620_v34 = vmul.f32 0.03125, %v1619_v32  ;;  %v1624_v38 = vsub.f32 %v1607_v6, %v1615_v31 }
0x119a   : > { %v1622_v35 = vsub.f32 %v1620_v34, %v1621_v33 }
0x119c   : > { %v1623_v36 = vmax.f32 %v1622_v35, 0.0 }
0x119e   : > { %v1625_v37 = vadd.f32 1e-05, %v1623_v36 }
0x11a0   : > { %2473 = vrsqrt.f32 %v1625_v37 }
0x11aa   : > { %v2474_v39 = vpop.eup %2473 }
0x11ab   : > { %v1627_v41 = vmul.f32 %v2474_v39, %v1624_v38 }
0x11ad   : > { %v1634_v43 = vmul.f32 %v2114_v40, %v1627_v41 }
0x11af   : > { %v1641_v44 = vadd.f32 %v2115_v42, %v1634_v43 }
0x11b1   : > { %v1642_v45 = vpack.c.bf16 %v1641_v44, %v1641_v44 }
0x11b3   : > { %2311 = vmatmul.mubr.msk.bf16.vlgmr.msra.gmra.mrb[24].mxu1 %vm658_vm1, %v1642_v45 }
0x11b4   : > { %2338 = vmatprep.mubr.msk.bf16.mxu1 %vm2680_vm0, %v2679_v0  ;;  %2335 = vmatpush3.bf16.msra.mxu1 %v2451_v2 }
0x11b5   : > { %2336 = vmatprep.subr.bf16.mxu1 %v2679_v0  ;;  %v2136_v0 = vld [vmem:[%s3248_s14 + $0x1] ss:$0 sm:$0xff] }
0x11b8   : > { %2337 = vmatpush3.bf16.msra.mxu1 %v2452_v3 }
0x1286   : > { %v1705_v49 = vpop.f32.mrb[24].mxu1 }
0x1287   : > { %v1706_v50 = vadd.f32 %v2120_v48, %v1705_v49  ;;  %v2312_v51 = vpop.f32.mrb[25].mxu1 }
0x1288   : > { %v1708_v52 = vpop.f32.mrb[26].mxu1 }
0x1289   : > { %v1711_v53 = vmax.f32 %v1706_v50, 0.0  ;;  %v2313_v54 = vpop.f32.mrb[27].mxu1 }
0x128b   : > { %v1712_v55 = vpack.c.bf16 %v1711_v53, %v1711_v53 }
0x128d   : > { %2331 = vmatmul.mubr.bf16.vlgmr.msra.gmra.mrb[32].mxu0 %v1712_v55 }
0x1360   : > { %v1820_v57 = vpop.f32.mrb[32].mxu0 }
0x1361   : > { %v1821_v58 = vadd.f32 %v2124_v56, %v1820_v57  ;;  %v2332_v59 = vpop.f32.mrb[33].mxu0 }
0x1362   : > { %v1823_v60 = vpop.f32.mrb[34].mxu0 }
0x1363   : > { %v1826_v20 = vadd.f32 %v1821_v58, %v1641_v44  ;;  %v2333_v61 = vpop.f32.mrb[35].mxu0 }
0x1365   : > { %v1831_v62 = vsel %vm658_vm1, %v1826_v20, 0.0  ;;  %v1835_v63 = vmul.f32 %v1826_v20, %v1826_v20 }
0x1366   : > { %1832 = vadd.xlane.f32.xlu1 %v1831_v62 }
0x1367   : > { %v1836_v1 = vsel %vm658_vm1, %v1835_v63, 0.0 }
0x1368   : > { %1837 = vadd.xlane.f32.xlu0 %v1836_v1 }
0x13f3   : > { %v1833_v4 = vpop.xlane.xlu1 %1832 }
0x13f4   : > { %v1834_v5 = vmul.f32 0.03125, %v1833_v4 }
0x13f5   : > { %v1838_v7 = vpop.xlane.xlu0 %1837 }
0x13f6   : > { %v1840_v8 = vmul.f32 %v1834_v5, %v1834_v5  ;;  %v1839_v9 = vmul.f32 0.03125, %v1838_v7  ;;  %v1843_v13 = vsub.f32 %v1826_v20, %v1834_v5 }
0x13f8   : > { %v1841_v10 = vsub.f32 %v1839_v9, %v1840_v8 }
0x13fa   : > { %v1842_v11 = vmax.f32 %v1841_v10, 0.0 }
0x13fc   : > { %v1844_v12 = vadd.f32 1e-05, %v1842_v11 }
0x13fe   : > { %2475 = vrsqrt.f32 %v1844_v12 }
0x1408   : > { %v2476_v15 = vpop.eup %2475 }
0x1409   : > { %v1846_v17 = vmul.f32 %v2476_v15, %v1843_v13 }
0x140b   : > { %v1853_v6 = vmul.f32 %v2135_v16, %v1846_v17 }
0x140d   : > { %v1860_v18 = vadd.f32 %v2136_v0, %v1853_v6 }
0x140f   : > { %v1861_v19 = vpack.c.bf16 %v1860_v18, %v1860_v18 }
0x1411   : > { %2339 = vmatmul.mubr.msk.bf16.vlgmr.msra.gmra.mrb[28].mxu1 %vm658_vm1, %v1861_v19 }
0x14e4   : > { %v1922_v22 = vpop.f32.mrb[28].mxu1 }
0x14e5   : > { %v1923_v23 = vadd.f32 %v2137_v21, %v1922_v22  ;;  %v2340_v24 = vpop.f32.mrb[29].mxu1 }
0x14e6   : > { %v1925_v14 = vpop.f32.mrb[30].mxu1 }
0x14e7   : > { %1928 = vst [vmem:[%s627_s0] sm:$0xff] %v1923_v23  ;;  %v2341_v25 = vpop.f32.mrb[31].mxu1 }
0x14e8 PF: > { %s3251_s28 = sld [smem:[#allocation16_spill]] }
0x14ee   : > { %s31_s24 = sadd.s32 1, %s3251_s28  }
0x14ef   : > { %p28_p9 = scmp.ge.s32.totalorder %s31_s24, 4  }
0x14f1   :  { %30 = sbr.rel (!%p28_p9) target bundleno = 12 (0xc), region = 155 }
0x14f8   :  { %1948 = vsyncpa [#allocation3], 1 }
0x14f9   :  { %1950 = vsyncpa [#allocation3 + $0x1], 1 }
0x14fa   :  { %1951 = vsyncpa [#allocation5], 1 }
0x14fb   :  { %1952 = vsyncpa [#allocation8], 1 }
0x14fc   :  { %1953 = vsyncpa [#allocation11], 1 }

</bundles_post_ra>
